<compile_context>
chip_gen: v5e
topology: v5e:2x2
jax: 0.10.0
libtpu: 0.0.40
codegen_flags: <defaults>
</compile_context>

<pallas_src>
import functools

import jax
import jax.numpy as jnp
import numpy as np
from jax.experimental import pallas as pl
from jax.experimental.pallas import tpu as pltpu

NEG_SLOPE = 0.01
BN_EPS = 1e-5
LANE = 128
VMEM_LIMIT = 48 * 1024 * 1024         # < v7x's 64 MiB physical per TC; fine on v5e/v6e
VMEM_TILE_BUDGET = 40 * 1024 * 1024   # target for the double-buffered per-tile footprint


def _round_up(x, m):
    return (x + m - 1) // m * m


def _pad_channels(c):
    # Lane-dense (128) epilogue; >128 channels rounded to 256 so the matmul N-dim matches
    # the 256-wide MXU on v6e/v7x.
    cp = _round_up(c, LANE)
    return cp if cp <= LANE else _round_up(cp, 2 * LANE)


def _pick_tile_m(m, bytes_per_row, target=1024):
    """Largest multiple-of-8 row tile whose double-buffered footprint fits the VMEM budget,
    then shrunk so the last tile wastes as few rows as possible."""
    tm = min(_round_up(target, 8), _round_up(m, 8))
    while tm > 8 and 2 * tm * bytes_per_row > VMEM_TILE_BUDGET:
        tm = max(8, _round_up(tm // 2, 8))
    n_tiles = -(-m // tm)
    tm = min(tm, _round_up(-(-m // n_tiles), 8))
    return tm


# ------------------------- Pallas kernels -------------------------

def _make_stats_kernel(*, n_rows, mask_last):
    def kernel(p_ref, w_ref, z_ref, sum_ref, sq_ref):
        i = pl.program_id(0)
        # (tile_m, K) @ (K, Coutp) on the MXU, f32 accumulation.
        z = jnp.dot(p_ref[...], w_ref[...], preferred_element_type=jnp.float32)
        z_ref[...] = z.astype(z_ref.dtype)          # pre-BN activations, bf16, single pass

        @pl.when(i == 0)
        def _():
            sum_ref[...] = jnp.zeros_like(sum_ref)
            sq_ref[...] = jnp.zeros_like(sq_ref)

        if mask_last:
            tm = z.shape[0]
            rows = jax.lax.broadcasted_iota(jnp.int32, (tm, 1), 0) + i * tm
            z = jnp.where(rows < n_rows, z, 0.0)    # drop out-of-range rows from the stats

        # Keep the sublane dim: (tile_m, C) -> (tile_m//8, 8, C) and reduce the leading dim
        # (pure VALU adds, no cross-sublane XLU work). Final 8->1 reduce happens outside.
        z3 = z.reshape(z.shape[0] // 8, 8, z.shape[1])
        sum_ref[...] += jnp.sum(z3, axis=0)
        sq_ref[...] += jnp.sum(z3 * z3, axis=0)

    return kernel


def _make_apply_kernel(*, has_residual, apply_act):
    def kernel(*refs):
        if has_residual:
            z_ref, ss_ref, r_ref, rss_ref, o_ref = refs
        else:
            z_ref, ss_ref, o_ref = refs
        ss = ss_ref[...]                                            # (2, Coutp): scale, shift
        out = z_ref[...].astype(jnp.float32) * ss[0:1, :] + ss[1:2, :]
        if has_residual:
            rss = rss_ref[...]
            out = out + r_ref[...].astype(jnp.float32) * rss[0:1, :] + rss[1:2, :]
        if apply_act:
            out = jnp.where(out >= 0, out, NEG_SLOPE * out)
        o_ref[...] = out.astype(o_ref.dtype)

    return kernel


# ------------------------- Pallas wrappers -------------------------

def conv_stats(patches, w_mat):
    """patches (M, K) bf16, w_mat (K, Coutp) bf16 ->
       z (M, Coutp) bf16 pre-BN activations, and (8, Coutp) f32 partial sum / sumsq."""
    M, K = patches.shape
    Coutp = w_mat.shape[1]
    tile_m = _pick_tile_m(M, (K + Coutp) * 2)
    n_tiles = pl.cdiv(M, tile_m)
    mask_last = (M % tile_m) != 0

    return pl.pallas_call(
        _make_stats_kernel(n_rows=M, mask_last=mask_last),
        grid=(n_tiles,),
        in_specs=[
            pl.BlockSpec((tile_m, K), lambda i: (i, 0)),
            # Constant-index weight block: DMA'd once, stays resident across the grid.
            # TODO(synk): pipeline_mode=pl.Buffered(1) would halve its VMEM footprint.
            pl.BlockSpec((K, Coutp), lambda i: (0, 0)),
        ],
        out_specs=(
            pl.BlockSpec((tile_m, Coutp), lambda i: (i, 0)),
            pl.BlockSpec((8, Coutp), lambda i: (0, 0)),   # resident accumulators,
            pl.BlockSpec((8, Coutp), lambda i: (0, 0)),   # written back once at the end
        ),
        out_shape=(
            jax.ShapeDtypeStruct((M, Coutp), jnp.bfloat16),
            jax.ShapeDtypeStruct((8, Coutp), jnp.float32),
            jax.ShapeDtypeStruct((8, Coutp), jnp.float32),
        ),
        compiler_params=pltpu.CompilerParams(
            dimension_semantics=("arbitrary",),           # sequential stats accumulation
            vmem_limit_bytes=VMEM_LIMIT),
    )(patches, w_mat)


def bn_apply(z, scale_shift, *, residual=None, residual_scale_shift=None,
             apply_act=False):
    """out = [lrelu]( z*scale + shift [+ residual*scale_r + shift_r] ), bf16 in / bf16 out."""
    M, Coutp = z.shape
    has_res = residual is not None
    tile_m = _pick_tile_m(M, (3 if has_res else 2) * Coutp * 2, target=2048)
    n_tiles = pl.cdiv(M, tile_m)

    in_specs = [pl.BlockSpec((tile_m, Coutp), lambda i: (i, 0)),
                pl.BlockSpec((2, Coutp), lambda i: (0, 0))]
    args = [z, scale_shift]
    if has_res:
        in_specs += [pl.BlockSpec((tile_m, Coutp), lambda i: (i, 0)),
                     pl.BlockSpec((2, Coutp), lambda i: (0, 0))]
        args += [residual, residual_scale_shift]

    return pl.pallas_call(
        _make_apply_kernel(has_residual=has_res, apply_act=apply_act),
        grid=(n_tiles,),
        in_specs=in_specs,
        out_specs=pl.BlockSpec((tile_m, Coutp), lambda i: (i, 0)),
        out_shape=jax.ShapeDtypeStruct((M, Coutp), jnp.bfloat16),
        compiler_params=pltpu.CompilerParams(
            dimension_semantics=("parallel",),            # independent M tiles (v7x megacore)
            vmem_limit_bytes=VMEM_LIMIT),
    )(*args)


# ------------------------- JAX glue (im2col, layout, BN fold) -------------------------

def im2col(x_nhwc, kh, kw, stride, pad):
    """(N, H, W, C) -> (N*Ho*Wo, kh*kw*C), column order (kh, kw, c). dtype preserved (bf16)."""
    if pad > 0:
        x_nhwc = jnp.pad(x_nhwc, ((0, 0), (pad, pad), (pad, pad), (0, 0)))
    N, Hp, Wp, C = x_nhwc.shape
    Ho = (Hp - kh) // stride + 1
    Wo = (Wp - kw) // stride + 1
    cols = []
    for i in range(kh):
        for j in range(kw):
            cols.append(x_nhwc[:, i:i + (Ho - 1) * stride + 1:stride,
                               j:j + (Wo - 1) * stride + 1:stride, :])
    patches = jnp.concatenate(cols, axis=-1)              # (N, Ho, Wo, kh*kw*C)
    return patches.reshape(N * Ho * Wo, kh * kw * C), Ho, Wo


def weight_to_mat(w_oihw, coutp):
    """PyTorch (Cout, Cin, kh, kw) -> bf16 (kh*kw*Cin, Coutp), lane-padded, im2col order."""
    cout, cin, kh, kw = w_oihw.shape
    m = jnp.transpose(w_oihw, (2, 3, 1, 0)).reshape(kh * kw * cin, cout)
    return jnp.pad(m, ((0, 0), (0, coutp - cout))).astype(jnp.bfloat16)


def fold_bn(sum8, sq8, gamma, beta, n_rows, coutp):
    """Training-mode BN (biased variance over all rows) folded into per-channel scale/shift.
    Computed once per conv on (Coutp,)-sized vectors (negligible)."""
    n = jnp.float32(n_rows)
    mean = jnp.sum(sum8, axis=0) / n
    var = jnp.maximum(jnp.sum(sq8, axis=0) / n - mean * mean, 0.0)
    g = jnp.pad(gamma.astype(jnp.float32), (0, coutp - gamma.shape[0]))
    b = jnp.pad(beta.astype(jnp.float32), (0, coutp - beta.shape[0]))
    scale = g * jax.lax.rsqrt(var + BN_EPS)
    shift = b - mean * scale
    return jnp.stack([scale, shift])                      # (2, Coutp) f32


@functools.partial(jax.jit, static_argnums=2)
def basic_block_forward(x_nchw, params, down_simple):
    # Conv biases are dropped in the kernel path: they are exactly cancelled by the
    # training-mode BN mean subtraction that immediately follows each conv.
    x = jnp.transpose(x_nchw, (0, 2, 3, 1)).astype(jnp.bfloat16)     # NHWC bf16
    N, H, W, Cin = x.shape
    Cout = params["w1"].shape[0]
    Coutp = _pad_channels(Cout)

    # feature conv1: 3x3, stride=down_simple, pad=1 -> BN -> LeakyReLU
    # TODO(synk): move the 3x3 tap accumulation in-kernel (halo'd manual DMA) to avoid the
    # ~9x im2col duplication of input HBM traffic.
    p1, Ho, Wo = im2col(x, 3, 3, down_simple, 1)
    z1, s1, q1 = conv_stats(p1, weight_to_mat(params["w1"], Coutp))
    ss1 = fold_bn(s1, q1, params["g1"], params["be1"], p1.shape[0], Coutp)
    f1 = bn_apply(z1, ss1, apply_act=True)                           # (M, Coutp) bf16

    # resize branch: only the pre-BN conv output; its BN affine is fused into conv2's epilogue.
    if down_simple > 1 or Cin != Cout:
        pr, _, _ = im2col(x, down_simple, down_simple, down_simple, 0)
        zr, sr, qr = conv_stats(pr, weight_to_mat(params["wr"], Coutp))
        ssr = fold_bn(sr, qr, params["gr"], params["ber"], pr.shape[0], Coutp)
    else:
        zr = jnp.pad(x.reshape(N * H * W, Cin), ((0, 0), (0, Coutp - Cin)))
        ssr = jnp.stack([
            jnp.concatenate([jnp.ones((Cout,), jnp.float32),
                             jnp.zeros((Coutp - Cout,), jnp.float32)]),
            jnp.zeros((Coutp,), jnp.float32)])

    # feature conv2: 3x3, stride=1, pad=1 -> BN, fused + residual(BN) + LeakyReLU epilogue.
    # The channel slice folds into the im2col gather (no standalone slice round trip).
    f1_nhwc = f1.reshape(N, Ho, Wo, Coutp)[..., :Cout]
    p2, _, _ = im2col(f1_nhwc, 3, 3, 1, 1)
    z2, s2, q2 = conv_stats(p2, weight_to_mat(params["w2"], Coutp))
    ss2 = fold_bn(s2, q2, params["g2"], params["be2"], p2.shape[0], Coutp)
    y = bn_apply(z2, ss2, residual=zr, residual_scale_shift=ssr, apply_act=True)

    y = y.reshape(N, Ho, Wo, Coutp)[..., :Cout].astype(jnp.float32)
    return jnp.transpose(y, (0, 3, 1, 2))                            # back to NCHW


# ------------------------- pure-JAX reference (f32, with conv biases) -------------------------

def _ref_conv(x, w, b, stride, pad):
    out = jax.lax.conv_general_dilated(
        x, w, (stride, stride), [(pad, pad), (pad, pad)],
        dimension_numbers=("NCHW", "OIHW", "NCHW"))
    return out + b[None, :, None, None]


def _ref_bn(x, g, be):
    mean = jnp.mean(x, axis=(0, 2, 3), keepdims=True)
    var = jnp.mean(jnp.square(x - mean), axis=(0, 2, 3), keepdims=True)
    return (x - mean) * jax.lax.rsqrt(var + BN_EPS) * g[None, :, None, None] \
        + be[None, :, None, None]


def _ref_lrelu(x):
    return jnp.where(x >= 0, x, NEG_SLOPE * x)


def basic_block_reference(x, p, down_simple):
    cin, cout = x.shape[1], p["w1"].shape[0]
    f = _ref_lrelu(_ref_bn(_ref_conv(x, p["w1"], p["b1"], down_simple, 1),
                           p["g1"], p["be1"]))
    f = _ref_bn(_ref_conv(f, p["w2"], p["b2"], 1, 1), p["g2"], p["be2"])
    if down_simple > 1 or cin != cout:
        xr = _ref_bn(_ref_conv(x, p["wr"], p["br"], down_simple, 0),
                     p["gr"], p["ber"])
    else:
        xr = x
    return _ref_lrelu(xr + f)


# ------------------------- main -------------------------

if __name__ == "__main__":
    N, Cin, H, W = 2, 4, 16, 16
    Cout, down_simple = 8, 2

    key = jax.random.PRNGKey(0)
    ks = jax.random.split(key, 12)
    params = {
        "w1": 0.2 * jax.random.normal(ks[0], (Cout, Cin, 3, 3), jnp.float32),
        "b1": 0.1 * jax.random.normal(ks[1], (Cout,), jnp.float32),
        "g1": 1.0 + 0.1 * jax.random.normal(ks[2], (Cout,), jnp.float32),
        "be1": 0.1 * jax.random.normal(ks[3], (Cout,), jnp.float32),
        "w2": 0.2 * jax.random.normal(ks[4], (Cout, Cout, 3, 3), jnp.float32),
        "b2": 0.1 * jax.random.normal(ks[5], (Cout,), jnp.float32),
        "g2": 1.0 + 0.1 * jax.random.normal(ks[6], (Cout,), jnp.float32),
        "be2": 0.1 * jax.random.normal(ks[7], (Cout,), jnp.float32),
        "wr": 0.2 * jax.random.normal(ks[8], (Cout, Cin, down_simple, down_simple),
                                      jnp.float32),
        "br": 0.1 * jax.random.normal(ks[9], (Cout,), jnp.float32),
        "gr": 1.0 + 0.1 * jax.random.normal(ks[10], (Cout,), jnp.float32),
        "ber": 0.1 * jax.random.normal(ks[11], (Cout,), jnp.float32),
    }
    x = jax.random.normal(jax.random.PRNGKey(42), (N, Cin, H, W), jnp.float32)

    y = jax.block_until_ready(basic_block_forward(x, params, down_simple))
    y_ref = jax.block_until_ready(basic_block_reference(x, params, down_simple))

    assert y.shape == (N, Cout, H // down_simple, W // down_simple), y.shape
    np.testing.assert_allclose(np.asarray(y), np.asarray(y_ref),
                               rtol=5e-2, atol=5e-2)
    print("KERNEL_OK")
</pallas_src>

<mosaic_0001>
module attributes {stable_mosaic.version = 11 : i64} {
  func.func @kernel(%arg0: i32, %arg1: memref<128x128xbf16, #tpu.memory_space<vmem>>, %arg2: memref<2x128xf32, #tpu.memory_space<vmem>>, %arg3: memref<128x128xbf16, #tpu.memory_space<vmem>>) attributes {dimension_semantics = [#tpu.dimension_semantics<parallel>], iteration_bounds = array<i64: 1>, scalar_prefetch = 0 : i64, scratch_operands = 0 : i64, tpu.core_type = #tpu.core_type<tc>, window_params = [{transform_indices = @transform_0, window_bounds = array<i64: 128, 128>}, {pipeline_mode = #tpu.pipeline_mode<synchronous>, transform_indices = @transform_1, window_bounds = array<i64: 2, 128>}, {transform_indices = @transform_2, window_bounds = array<i64: 128, 128>}]} {
    %c0 = arith.constant 0 : index
    %c0_0 = arith.constant 0 : index
    %0 = vector.load %arg2[%c0, %c0_0] : memref<2x128xf32, #tpu.memory_space<vmem>>, vector<2x128xf32>
    %c0_1 = arith.constant 0 : index
    %c0_2 = arith.constant 0 : index
    %1 = vector.load %arg1[%c0_1, %c0_2] : memref<128x128xbf16, #tpu.memory_space<vmem>>, vector<128x128xbf16>
    %2 = arith.extf %1 : vector<128x128xbf16> to vector<128x128xf32>
    %3 = vector.extract_strided_slice %0 {offsets = [0, 0], sizes = [1, 128], strides = [1, 1]} : vector<2x128xf32> to vector<1x128xf32>
    %4 = vector.broadcast %3 : vector<1x128xf32> to vector<128x128xf32>
    %5 = arith.mulf %2, %4 : vector<128x128xf32>
    %6 = vector.extract_strided_slice %0 {offsets = [1, 0], sizes = [1, 128], strides = [1, 1]} : vector<2x128xf32> to vector<1x128xf32>
    %7 = vector.broadcast %6 : vector<1x128xf32> to vector<128x128xf32>
    %8 = arith.addf %5, %7 : vector<128x128xf32>
    %cst = arith.constant 0.000000e+00 : f32
    %9 = vector.broadcast %cst : f32 to vector<128x128xf32>
    %10 = arith.cmpf oge, %8, %9 : vector<128x128xf32>
    %cst_3 = arith.constant 0.00999999977 : f32
    %11 = vector.broadcast %cst_3 : f32 to vector<128x128xf32>
    %12 = arith.mulf %11, %8 : vector<128x128xf32>
    %13 = arith.select %10, %8, %12 : vector<128x128xi1>, vector<128x128xf32>
    %14 = arith.truncf %13 : vector<128x128xf32> to vector<128x128xbf16>
    %c0_4 = arith.constant 0 : index
    %c0_5 = arith.constant 0 : index
    %15 = vector.load %arg3[%c0_4, %c0_5] : memref<128x128xbf16, #tpu.memory_space<vmem>>, vector<128x128xbf16>
    tpu.vector_store %arg3[%c0_4, %c0_5], %14 {strides = array<i32>} : memref<128x128xbf16, #tpu.memory_space<vmem>>, vector<128x128xbf16>,
    return
  }
  func.func @transform_0(%arg0: i32) -> (i32, i32) {
    %c0_i32 = arith.constant 0 : i32
    %c0_i32_0 = arith.constant 0 : i32
    return %arg0, %c0_i32 : i32, i32
  }
  func.func @transform_1(%arg0: i32) -> (i32, i32) {
    %c0_i32 = arith.constant 0 : i32
    %c0_i32_0 = arith.constant 0 : i32
    %c0_i32_1 = arith.constant 0 : i32
    return %c0_i32, %c0_i32_0 : i32, i32
  }
  func.func @transform_2(%arg0: i32) -> (i32, i32) {
    %c0_i32 = arith.constant 0 : i32
    %c0_i32_0 = arith.constant 0 : i32
    return %arg0, %c0_i32 : i32, i32
  }
}

module attributes {stable_mosaic.version = 11 : i64} {
  func.func @kernel(%arg0: i32, %arg1: memref<128x36xbf16, #tpu.memory_space<vmem>>, %arg2: memref<36x128xbf16, #tpu.memory_space<vmem>>, %arg3: memref<128x128xbf16, #tpu.memory_space<vmem>>, %arg4: memref<8x128xf32, #tpu.memory_space<vmem>>, %arg5: memref<8x128xf32, #tpu.memory_space<vmem>>) attributes {dimension_semantics = [#tpu.dimension_semantics<arbitrary>], iteration_bounds = array<i64: 1>, scalar_prefetch = 0 : i64, scratch_operands = 0 : i64, tpu.core_type = #tpu.core_type<tc>, window_params = [{transform_indices = @transform_0, window_bounds = array<i64: 128, 36>}, {pipeline_mode = #tpu.pipeline_mode<synchronous>, transform_indices = @transform_1, window_bounds = array<i64: 36, 128>}, {transform_indices = @transform_2, window_bounds = array<i64: 128, 128>}, {pipeline_mode = #tpu.pipeline_mode<synchronous>, transform_indices = @transform_3, window_bounds = array<i64: 8, 128>}, {pipeline_mode = #tpu.pipeline_mode<synchronous>, transform_indices = @transform_4, window_bounds = array<i64: 8, 128>}]} {
    %c0 = arith.constant 0 : index
    %c0_0 = arith.constant 0 : index
    %0 = vector.load %arg1[%c0, %c0_0] : memref<128x36xbf16, #tpu.memory_space<vmem>>, vector<128x36xbf16>
    %c0_1 = arith.constant 0 : index
    %c0_2 = arith.constant 0 : index
    %1 = vector.load %arg2[%c0_1, %c0_2] : memref<36x128xbf16, #tpu.memory_space<vmem>>, vector<36x128xbf16>
    %cst = arith.constant dense<0.000000e+00> : vector<128x128xf32>
    %2 = tpu.matmul %0, %1, %cst {dimension_numbers = #tpu.dot_dimension_numbers<[1], [0], [0], [1], [0, 0, 1, 1], [], []>} : vector<128x36xbf16>, vector<36x128xbf16>, vector<128x128xf32> -> vector<128x128xf32>
    %3 = arith.truncf %2 : vector<128x128xf32> to vector<128x128xbf16>
    %c0_3 = arith.constant 0 : index
    %c0_4 = arith.constant 0 : index
    %4 = vector.load %arg3[%c0_3, %c0_4] : memref<128x128xbf16, #tpu.memory_space<vmem>>, vector<128x128xbf16>
    tpu.vector_store %arg3[%c0_3, %c0_4], %3 {strides = array<i32>} : memref<128x128xbf16, #tpu.memory_space<vmem>>, vector<128x128xbf16>,
    %c0_i32 = arith.constant 0 : i32
    %5 = arith.cmpi eq, %arg0, %c0_i32 : i32
    %6 = arith.extui %5 : i1 to i32
    %c0_i32_5 = arith.constant 0 : i32
    %7 = arith.cmpi ne, %6, %c0_i32_5 : i32
    scf.if %7 {
      %cst_16 = arith.constant 0.000000e+00 : f32
      %18 = vector.broadcast %cst_16 : f32 to vector<8x128xf32>
      %c0_17 = arith.constant 0 : index
      %c0_18 = arith.constant 0 : index
      %19 = vector.load %arg4[%c0_17, %c0_18] : memref<8x128xf32, #tpu.memory_space<vmem>>, vector<8x128xf32>
      tpu.vector_store %arg4[%c0_17, %c0_18], %18 {strides = array<i32>} : memref<8x128xf32, #tpu.memory_space<vmem>>, vector<8x128xf32>,
      %cst_19 = arith.constant 0.000000e+00 : f32
      %20 = vector.broadcast %cst_19 : f32 to vector<8x128xf32>
      %c0_20 = arith.constant 0 : index
      %c0_21 = arith.constant 0 : index
      %21 = vector.load %arg5[%c0_20, %c0_21] : memref<8x128xf32, #tpu.memory_space<vmem>>, vector<8x128xf32>
      tpu.vector_store %arg5[%c0_20, %c0_21], %20 {strides = array<i32>} : memref<8x128xf32, #tpu.memory_space<vmem>>, vector<8x128xf32>,
    } else {
    }
    %8 = vector.shape_cast %2 : vector<128x128xf32> to vector<16x8x128xf32>
    %c0_6 = arith.constant 0 : index
    %c0_7 = arith.constant 0 : index
    %9 = vector.load %arg4[%c0_6, %c0_7] : memref<8x128xf32, #tpu.memory_space<vmem>>, vector<8x128xf32>
    %cst_8 = arith.constant dense<0.000000e+00> : vector<8x128xf32>
    %10 = vector.multi_reduction <add>, %8, %cst_8 [0] : vector<16x8x128xf32> to vector<8x128xf32>
    %11 = arith.addf %9, %10 : vector<8x128xf32>
    %c0_9 = arith.constant 0 : index
    %c0_10 = arith.constant 0 : index
    %12 = vector.load %arg4[%c0_9, %c0_10] : memref<8x128xf32, #tpu.memory_space<vmem>>, vector<8x128xf32>
    tpu.vector_store %arg4[%c0_9, %c0_10], %11 {strides = array<i32>} : memref<8x128xf32, #tpu.memory_space<vmem>>, vector<8x128xf32>,
    %c0_11 = arith.constant 0 : index
    %c0_12 = arith.constant 0 : index
    %13 = vector.load %arg5[%c0_11, %c0_12] : memref<8x128xf32, #tpu.memory_space<vmem>>, vector<8x128xf32>
    %14 = arith.mulf %8, %8 : vector<16x8x128xf32>
    %cst_13 = arith.constant dense<0.000000e+00> : vector<8x128xf32>
    %15 = vector.multi_reduction <add>, %14, %cst_13 [0] : vector<16x8x128xf32> to vector<8x128xf32>
    %16 = arith.addf %13, %15 : vector<8x128xf32>
    %c0_14 = arith.constant 0 : index
    %c0_15 = arith.constant 0 : index
    %17 = vector.load %arg5[%c0_14, %c0_15] : memref<8x128xf32, #tpu.memory_space<vmem>>, vector<8x128xf32>
    tpu.vector_store %arg5[%c0_14, %c0_15], %16 {strides = array<i32>} : memref<8x128xf32, #tpu.memory_space<vmem>>, vector<8x128xf32>,
    return
  }
  func.func @transform_0(%arg0: i32) -> (i32, i32) {
    %c0_i32 = arith.constant 0 : i32
    %c0_i32_0 = arith.constant 0 : i32
    return %arg0, %c0_i32 : i32, i32
  }
  func.func @transform_1(%arg0: i32) -> (i32, i32) {
    %c0_i32 = arith.constant 0 : i32
    %c0_i32_0 = arith.constant 0 : i32
    %c0_i32_1 = arith.constant 0 : i32
    return %c0_i32, %c0_i32_0 : i32, i32
  }
  func.func @transform_2(%arg0: i32) -> (i32, i32) {
    %c0_i32 = arith.constant 0 : i32
    %c0_i32_0 = arith.constant 0 : i32
    return %arg0, %c0_i32 : i32, i32
  }
  func.func @transform_3(%arg0: i32) -> (i32, i32) {
    %c0_i32 = arith.constant 0 : i32
    %c0_i32_0 = arith.constant 0 : i32
    %c0_i32_1 = arith.constant 0 : i32
    return %c0_i32, %c0_i32_0 : i32, i32
  }
  func.func @transform_4(%arg0: i32) -> (i32, i32) {
    %c0_i32 = arith.constant 0 : i32
    %c0_i32_0 = arith.constant 0 : i32
    %c0_i32_1 = arith.constant 0 : i32
    return %c0_i32, %c0_i32_0 : i32, i32
  }
}

module attributes {stable_mosaic.version = 11 : i64} {
  func.func @kernel(%arg0: i32, %arg1: memref<128x72xbf16, #tpu.memory_space<vmem>>, %arg2: memref<72x128xbf16, #tpu.memory_space<vmem>>, %arg3: memref<128x128xbf16, #tpu.memory_space<vmem>>, %arg4: memref<8x128xf32, #tpu.memory_space<vmem>>, %arg5: memref<8x128xf32, #tpu.memory_space<vmem>>) attributes {dimension_semantics = [#tpu.dimension_semantics<arbitrary>], iteration_bounds = array<i64: 1>, scalar_prefetch = 0 : i64, scratch_operands = 0 : i64, tpu.core_type = #tpu.core_type<tc>, window_params = [{transform_indices = @transform_0, window_bounds = array<i64: 128, 72>}, {pipeline_mode = #tpu.pipeline_mode<synchronous>, transform_indices = @transform_1, window_bounds = array<i64: 72, 128>}, {transform_indices = @transform_2, window_bounds = array<i64: 128, 128>}, {pipeline_mode = #tpu.pipeline_mode<synchronous>, transform_indices = @transform_3, window_bounds = array<i64: 8, 128>}, {pipeline_mode = #tpu.pipeline_mode<synchronous>, transform_indices = @transform_4, window_bounds = array<i64: 8, 128>}]} {
    %c0 = arith.constant 0 : index
    %c0_0 = arith.constant 0 : index
    %0 = vector.load %arg1[%c0, %c0_0] : memref<128x72xbf16, #tpu.memory_space<vmem>>, vector<128x72xbf16>
    %c0_1 = arith.constant 0 : index
    %c0_2 = arith.constant 0 : index
    %1 = vector.load %arg2[%c0_1, %c0_2] : memref<72x128xbf16, #tpu.memory_space<vmem>>, vector<72x128xbf16>
    %cst = arith.constant dense<0.000000e+00> : vector<128x128xf32>
    %2 = tpu.matmul %0, %1, %cst {dimension_numbers = #tpu.dot_dimension_numbers<[1], [0], [0], [1], [0, 0, 1, 1], [], []>} : vector<128x72xbf16>, vector<72x128xbf16>, vector<128x128xf32> -> vector<128x128xf32>
    %3 = arith.truncf %2 : vector<128x128xf32> to vector<128x128xbf16>
    %c0_3 = arith.constant 0 : index
    %c0_4 = arith.constant 0 : index
    %4 = vector.load %arg3[%c0_3, %c0_4] : memref<128x128xbf16, #tpu.memory_space<vmem>>, vector<128x128xbf16>
    tpu.vector_store %arg3[%c0_3, %c0_4], %3 {strides = array<i32>} : memref<128x128xbf16, #tpu.memory_space<vmem>>, vector<128x128xbf16>,
    %c0_i32 = arith.constant 0 : i32
    %5 = arith.cmpi eq, %arg0, %c0_i32 : i32
    %6 = arith.extui %5 : i1 to i32
    %c0_i32_5 = arith.constant 0 : i32
    %7 = arith.cmpi ne, %6, %c0_i32_5 : i32
    scf.if %7 {
      %cst_16 = arith.constant 0.000000e+00 : f32
      %18 = vector.broadcast %cst_16 : f32 to vector<8x128xf32>
      %c0_17 = arith.constant 0 : index
      %c0_18 = arith.constant 0 : index
      %19 = vector.load %arg4[%c0_17, %c0_18] : memref<8x128xf32, #tpu.memory_space<vmem>>, vector<8x128xf32>
      tpu.vector_store %arg4[%c0_17, %c0_18], %18 {strides = array<i32>} : memref<8x128xf32, #tpu.memory_space<vmem>>, vector<8x128xf32>,
      %cst_19 = arith.constant 0.000000e+00 : f32
      %20 = vector.broadcast %cst_19 : f32 to vector<8x128xf32>
      %c0_20 = arith.constant 0 : index
      %c0_21 = arith.constant 0 : index
      %21 = vector.load %arg5[%c0_20, %c0_21] : memref<8x128xf32, #tpu.memory_space<vmem>>, vector<8x128xf32>
      tpu.vector_store %arg5[%c0_20, %c0_21], %20 {strides = array<i32>} : memref<8x128xf32, #tpu.memory_space<vmem>>, vector<8x128xf32>,
    } else {
    }
    %8 = vector.shape_cast %2 : vector<128x128xf32> to vector<16x8x128xf32>
    %c0_6 = arith.constant 0 : index
    %c0_7 = arith.constant 0 : index
    %9 = vector.load %arg4[%c0_6, %c0_7] : memref<8x128xf32, #tpu.memory_space<vmem>>, vector<8x128xf32>
    %cst_8 = arith.constant dense<0.000000e+00> : vector<8x128xf32>
    %10 = vector.multi_reduction <add>, %8, %cst_8 [0] : vector<16x8x128xf32> to vector<8x128xf32>
    %11 = arith.addf %9, %10 : vector<8x128xf32>
    %c0_9 = arith.constant 0 : index
    %c0_10 = arith.constant 0 : index
    %12 = vector.load %arg4[%c0_9, %c0_10] : memref<8x128xf32, #tpu.memory_space<vmem>>, vector<8x128xf32>
    tpu.vector_store %arg4[%c0_9, %c0_10], %11 {strides = array<i32>} : memref<8x128xf32, #tpu.memory_space<vmem>>, vector<8x128xf32>,
    %c0_11 = arith.constant 0 : index
    %c0_12 = arith.constant 0 : index
    %13 = vector.load %arg5[%c0_11, %c0_12] : memref<8x128xf32, #tpu.memory_space<vmem>>, vector<8x128xf32>
    %14 = arith.mulf %8, %8 : vector<16x8x128xf32>
    %cst_13 = arith.constant dense<0.000000e+00> : vector<8x128xf32>
    %15 = vector.multi_reduction <add>, %14, %cst_13 [0] : vector<16x8x128xf32> to vector<8x128xf32>
    %16 = arith.addf %13, %15 : vector<8x128xf32>
    %c0_14 = arith.constant 0 : index
    %c0_15 = arith.constant 0 : index
    %17 = vector.load %arg5[%c0_14, %c0_15] : memref<8x128xf32, #tpu.memory_space<vmem>>, vector<8x128xf32>
    tpu.vector_store %arg5[%c0_14, %c0_15], %16 {strides = array<i32>} : memref<8x128xf32, #tpu.memory_space<vmem>>, vector<8x128xf32>,
    return
  }
  func.func @transform_0(%arg0: i32) -> (i32, i32) {
    %c0_i32 = arith.constant 0 : i32
    %c0_i32_0 = arith.constant 0 : i32
    return %arg0, %c0_i32 : i32, i32
  }
  func.func @transform_1(%arg0: i32) -> (i32, i32) {
    %c0_i32 = arith.constant 0 : i32
    %c0_i32_0 = arith.constant 0 : i32
    %c0_i32_1 = arith.constant 0 : i32
    return %c0_i32, %c0_i32_0 : i32, i32
  }
  func.func @transform_2(%arg0: i32) -> (i32, i32) {
    %c0_i32 = arith.constant 0 : i32
    %c0_i32_0 = arith.constant 0 : i32
    return %arg0, %c0_i32 : i32, i32
  }
  func.func @transform_3(%arg0: i32) -> (i32, i32) {
    %c0_i32 = arith.constant 0 : i32
    %c0_i32_0 = arith.constant 0 : i32
    %c0_i32_1 = arith.constant 0 : i32
    return %c0_i32, %c0_i32_0 : i32, i32
  }
  func.func @transform_4(%arg0: i32) -> (i32, i32) {
    %c0_i32 = arith.constant 0 : i32
    %c0_i32_0 = arith.constant 0 : i32
    %c0_i32_1 = arith.constant 0 : i32
    return %c0_i32, %c0_i32_0 : i32, i32
  }
}

module attributes {stable_mosaic.version = 11 : i64} {
  func.func @kernel(%arg0: i32, %arg1: memref<128x16xbf16, #tpu.memory_space<vmem>>, %arg2: memref<16x128xbf16, #tpu.memory_space<vmem>>, %arg3: memref<128x128xbf16, #tpu.memory_space<vmem>>, %arg4: memref<8x128xf32, #tpu.memory_space<vmem>>, %arg5: memref<8x128xf32, #tpu.memory_space<vmem>>) attributes {dimension_semantics = [#tpu.dimension_semantics<arbitrary>], iteration_bounds = array<i64: 1>, scalar_prefetch = 0 : i64, scratch_operands = 0 : i64, tpu.core_type = #tpu.core_type<tc>, window_params = [{transform_indices = @transform_0, window_bounds = array<i64: 128, 16>}, {pipeline_mode = #tpu.pipeline_mode<synchronous>, transform_indices = @transform_1, window_bounds = array<i64: 16, 128>}, {transform_indices = @transform_2, window_bounds = array<i64: 128, 128>}, {pipeline_mode = #tpu.pipeline_mode<synchronous>, transform_indices = @transform_3, window_bounds = array<i64: 8, 128>}, {pipeline_mode = #tpu.pipeline_mode<synchronous>, transform_indices = @transform_4, window_bounds = array<i64: 8, 128>}]} {
    %c0 = arith.constant 0 : index
    %c0_0 = arith.constant 0 : index
    %0 = vector.load %arg1[%c0, %c0_0] : memref<128x16xbf16, #tpu.memory_space<vmem>>, vector<128x16xbf16>
    %c0_1 = arith.constant 0 : index
    %c0_2 = arith.constant 0 : index
    %1 = vector.load %arg2[%c0_1, %c0_2] : memref<16x128xbf16, #tpu.memory_space<vmem>>, vector<16x128xbf16>
    %cst = arith.constant dense<0.000000e+00> : vector<128x128xf32>
    %2 = tpu.matmul %0, %1, %cst {dimension_numbers = #tpu.dot_dimension_numbers<[1], [0], [0], [1], [0, 0, 1, 1], [], []>} : vector<128x16xbf16>, vector<16x128xbf16>, vector<128x128xf32> -> vector<128x128xf32>
    %3 = arith.truncf %2 : vector<128x128xf32> to vector<128x128xbf16>
    %c0_3 = arith.constant 0 : index
    %c0_4 = arith.constant 0 : index
    %4 = vector.load %arg3[%c0_3, %c0_4] : memref<128x128xbf16, #tpu.memory_space<vmem>>, vector<128x128xbf16>
    tpu.vector_store %arg3[%c0_3, %c0_4], %3 {strides = array<i32>} : memref<128x128xbf16, #tpu.memory_space<vmem>>, vector<128x128xbf16>,
    %c0_i32 = arith.constant 0 : i32
    %5 = arith.cmpi eq, %arg0, %c0_i32 : i32
    %6 = arith.extui %5 : i1 to i32
    %c0_i32_5 = arith.constant 0 : i32
    %7 = arith.cmpi ne, %6, %c0_i32_5 : i32
    scf.if %7 {
      %cst_16 = arith.constant 0.000000e+00 : f32
      %18 = vector.broadcast %cst_16 : f32 to vector<8x128xf32>
      %c0_17 = arith.constant 0 : index
      %c0_18 = arith.constant 0 : index
      %19 = vector.load %arg4[%c0_17, %c0_18] : memref<8x128xf32, #tpu.memory_space<vmem>>, vector<8x128xf32>
      tpu.vector_store %arg4[%c0_17, %c0_18], %18 {strides = array<i32>} : memref<8x128xf32, #tpu.memory_space<vmem>>, vector<8x128xf32>,
      %cst_19 = arith.constant 0.000000e+00 : f32
      %20 = vector.broadcast %cst_19 : f32 to vector<8x128xf32>
      %c0_20 = arith.constant 0 : index
      %c0_21 = arith.constant 0 : index
      %21 = vector.load %arg5[%c0_20, %c0_21] : memref<8x128xf32, #tpu.memory_space<vmem>>, vector<8x128xf32>
      tpu.vector_store %arg5[%c0_20, %c0_21], %20 {strides = array<i32>} : memref<8x128xf32, #tpu.memory_space<vmem>>, vector<8x128xf32>,
    } else {
    }
    %8 = vector.shape_cast %2 : vector<128x128xf32> to vector<16x8x128xf32>
    %c0_6 = arith.constant 0 : index
    %c0_7 = arith.constant 0 : index
    %9 = vector.load %arg4[%c0_6, %c0_7] : memref<8x128xf32, #tpu.memory_space<vmem>>, vector<8x128xf32>
    %cst_8 = arith.constant dense<0.000000e+00> : vector<8x128xf32>
    %10 = vector.multi_reduction <add>, %8, %cst_8 [0] : vector<16x8x128xf32> to vector<8x128xf32>
    %11 = arith.addf %9, %10 : vector<8x128xf32>
    %c0_9 = arith.constant 0 : index
    %c0_10 = arith.constant 0 : index
    %12 = vector.load %arg4[%c0_9, %c0_10] : memref<8x128xf32, #tpu.memory_space<vmem>>, vector<8x128xf32>
    tpu.vector_store %arg4[%c0_9, %c0_10], %11 {strides = array<i32>} : memref<8x128xf32, #tpu.memory_space<vmem>>, vector<8x128xf32>,
    %c0_11 = arith.constant 0 : index
    %c0_12 = arith.constant 0 : index
    %13 = vector.load %arg5[%c0_11, %c0_12] : memref<8x128xf32, #tpu.memory_space<vmem>>, vector<8x128xf32>
    %14 = arith.mulf %8, %8 : vector<16x8x128xf32>
    %cst_13 = arith.constant dense<0.000000e+00> : vector<8x128xf32>
    %15 = vector.multi_reduction <add>, %14, %cst_13 [0] : vector<16x8x128xf32> to vector<8x128xf32>
    %16 = arith.addf %13, %15 : vector<8x128xf32>
    %c0_14 = arith.constant 0 : index
    %c0_15 = arith.constant 0 : index
    %17 = vector.load %arg5[%c0_14, %c0_15] : memref<8x128xf32, #tpu.memory_space<vmem>>, vector<8x128xf32>
    tpu.vector_store %arg5[%c0_14, %c0_15], %16 {strides = array<i32>} : memref<8x128xf32, #tpu.memory_space<vmem>>, vector<8x128xf32>,
    return
  }
  func.func @transform_0(%arg0: i32) -> (i32, i32) {
    %c0_i32 = arith.constant 0 : i32
    %c0_i32_0 = arith.constant 0 : i32
    return %arg0, %c0_i32 : i32, i32
  }
  func.func @transform_1(%arg0: i32) -> (i32, i32) {
    %c0_i32 = arith.constant 0 : i32
    %c0_i32_0 = arith.constant 0 : i32
    %c0_i32_1 = arith.constant 0 : i32
    return %c0_i32, %c0_i32_0 : i32, i32
  }
  func.func @transform_2(%arg0: i32) -> (i32, i32) {
    %c0_i32 = arith.constant 0 : i32
    %c0_i32_0 = arith.constant 0 : i32
    return %arg0, %c0_i32 : i32, i32
  }
  func.func @transform_3(%arg0: i32) -> (i32, i32) {
    %c0_i32 = arith.constant 0 : i32
    %c0_i32_0 = arith.constant 0 : i32
    %c0_i32_1 = arith.constant 0 : i32
    return %c0_i32, %c0_i32_0 : i32, i32
  }
  func.func @transform_4(%arg0: i32) -> (i32, i32) {
    %c0_i32 = arith.constant 0 : i32
    %c0_i32_0 = arith.constant 0 : i32
    %c0_i32_1 = arith.constant 0 : i32
    return %c0_i32, %c0_i32_0 : i32, i32
  }
}

module attributes {stable_mosaic.version = 11 : i64} {
  func.func @kernel(%arg0: i32, %arg1: memref<128x128xbf16, #tpu.memory_space<vmem>>, %arg2: memref<2x128xf32, #tpu.memory_space<vmem>>, %arg3: memref<128x128xbf16, #tpu.memory_space<vmem>>, %arg4: memref<2x128xf32, #tpu.memory_space<vmem>>, %arg5: memref<128x128xbf16, #tpu.memory_space<vmem>>) attributes {dimension_semantics = [#tpu.dimension_semantics<parallel>], iteration_bounds = array<i64: 1>, scalar_prefetch = 0 : i64, scratch_operands = 0 : i64, tpu.core_type = #tpu.core_type<tc>, window_params = [{transform_indices = @transform_0, window_bounds = array<i64: 128, 128>}, {pipeline_mode = #tpu.pipeline_mode<synchronous>, transform_indices = @transform_1, window_bounds = array<i64: 2, 128>}, {transform_indices = @transform_2, window_bounds = array<i64: 128, 128>}, {pipeline_mode = #tpu.pipeline_mode<synchronous>, transform_indices = @transform_3, window_bounds = array<i64: 2, 128>}, {transform_indices = @transform_4, window_bounds = array<i64: 128, 128>}]} {
    %c0 = arith.constant 0 : index
    %c0_0 = arith.constant 0 : index
    %0 = vector.load %arg2[%c0, %c0_0] : memref<2x128xf32, #tpu.memory_space<vmem>>, vector<2x128xf32>
    %c0_1 = arith.constant 0 : index
    %c0_2 = arith.constant 0 : index
    %1 = vector.load %arg1[%c0_1, %c0_2] : memref<128x128xbf16, #tpu.memory_space<vmem>>, vector<128x128xbf16>
    %2 = arith.extf %1 : vector<128x128xbf16> to vector<128x128xf32>
    %3 = vector.extract_strided_slice %0 {offsets = [0, 0], sizes = [1, 128], strides = [1, 1]} : vector<2x128xf32> to vector<1x128xf32>
    %4 = vector.broadcast %3 : vector<1x128xf32> to vector<128x128xf32>
    %5 = arith.mulf %2, %4 : vector<128x128xf32>
    %6 = vector.extract_strided_slice %0 {offsets = [1, 0], sizes = [1, 128], strides = [1, 1]} : vector<2x128xf32> to vector<1x128xf32>
    %7 = vector.broadcast %6 : vector<1x128xf32> to vector<128x128xf32>
    %8 = arith.addf %5, %7 : vector<128x128xf32>
    %c0_3 = arith.constant 0 : index
    %c0_4 = arith.constant 0 : index
    %9 = vector.load %arg4[%c0_3, %c0_4] : memref<2x128xf32, #tpu.memory_space<vmem>>, vector<2x128xf32>
    %c0_5 = arith.constant 0 : index
    %c0_6 = arith.constant 0 : index
    %10 = vector.load %arg3[%c0_5, %c0_6] : memref<128x128xbf16, #tpu.memory_space<vmem>>, vector<128x128xbf16>
    %11 = arith.extf %10 : vector<128x128xbf16> to vector<128x128xf32>
    %12 = vector.extract_strided_slice %9 {offsets = [0, 0], sizes = [1, 128], strides = [1, 1]} : vector<2x128xf32> to vector<1x128xf32>
    %13 = vector.broadcast %12 : vector<1x128xf32> to vector<128x128xf32>
    %14 = arith.mulf %11, %13 : vector<128x128xf32>
    %15 = arith.addf %8, %14 : vector<128x128xf32>
    %16 = vector.extract_strided_slice %9 {offsets = [1, 0], sizes = [1, 128], strides = [1, 1]} : vector<2x128xf32> to vector<1x128xf32>
    %17 = vector.broadcast %16 : vector<1x128xf32> to vector<128x128xf32>
    %18 = arith.addf %15, %17 : vector<128x128xf32>
    %cst = arith.constant 0.000000e+00 : f32
    %19 = vector.broadcast %cst : f32 to vector<128x128xf32>
    %20 = arith.cmpf oge, %18, %19 : vector<128x128xf32>
    %cst_7 = arith.constant 0.00999999977 : f32
    %21 = vector.broadcast %cst_7 : f32 to vector<128x128xf32>
    %22 = arith.mulf %21, %18 : vector<128x128xf32>
    %23 = arith.select %20, %18, %22 : vector<128x128xi1>, vector<128x128xf32>
    %24 = arith.truncf %23 : vector<128x128xf32> to vector<128x128xbf16>
    %c0_8 = arith.constant 0 : index
    %c0_9 = arith.constant 0 : index
    %25 = vector.load %arg5[%c0_8, %c0_9] : memref<128x128xbf16, #tpu.memory_space<vmem>>, vector<128x128xbf16>
    tpu.vector_store %arg5[%c0_8, %c0_9], %24 {strides = array<i32>} : memref<128x128xbf16, #tpu.memory_space<vmem>>, vector<128x128xbf16>,
    return
  }
  func.func @transform_0(%arg0: i32) -> (i32, i32) {
    %c0_i32 = arith.constant 0 : i32
    %c0_i32_0 = arith.constant 0 : i32
    return %arg0, %c0_i32 : i32, i32
  }
  func.func @transform_1(%arg0: i32) -> (i32, i32) {
    %c0_i32 = arith.constant 0 : i32
    %c0_i32_0 = arith.constant 0 : i32
    %c0_i32_1 = arith.constant 0 : i32
    return %c0_i32, %c0_i32_0 : i32, i32
  }
  func.func @transform_2(%arg0: i32) -> (i32, i32) {
    %c0_i32 = arith.constant 0 : i32
    %c0_i32_0 = arith.constant 0 : i32
    return %arg0, %c0_i32 : i32, i32
  }
  func.func @transform_3(%arg0: i32) -> (i32, i32) {
    %c0_i32 = arith.constant 0 : i32
    %c0_i32_0 = arith.constant 0 : i32
    %c0_i32_1 = arith.constant 0 : i32
    return %c0_i32, %c0_i32_0 : i32, i32
  }
  func.func @transform_4(%arg0: i32) -> (i32, i32) {
    %c0_i32 = arith.constant 0 : i32
    %c0_i32_0 = arith.constant 0 : i32
    return %arg0, %c0_i32 : i32, i32
  }
}

</mosaic_0001>

<bundles_post_ra>
// kernel: basic_block_forward.6
= control target key start
LH: loop header
LB: loop body
LE: loop exit
PB: predicated region body
PF: predicated region fallthrough
CT: control target
= control target key end

     0   :  { %s351_s0 = inlined_call_operand.vmem [shape: bf16[128,128], index: 0, kind: input, shape index: {}]   ;;  %s352_s1 = inlined_call_operand.vmem [shape: f32[2,128], index: 1, kind: input, shape index: {}]   ;;  %s353_s2 = inlined_call_operand.vmem [shape: bf16[128,128], index: 2, kind: output, shape index: {}]  }
   0x1   :  { %v11_v0 = vld [vmem:[%s352_s1] sm:$0x3]  ;;  %v234_v2 = vld [vmem:[%s351_s0 + $0x8] sm:$0xff]   ;;  %v235_v7 = vld [vmem:[%s351_s0 + $0x10] sm:$0xff]  }
   0x2   :  { %v163_v1 = vld [vmem:[%s351_s0] sm:$0xff]   ;;  %v272_v5 = vperm.slane %v11_v0, 0  ;;  %v274_v6 = vperm.slane %v11_v0, 1  ;;  %v236_v8 = vld [vmem:[%s351_s0 + $0x18] sm:$0xff]   ;;  %v168_v9 = vunpack.c.l.bf16 %v234_v2  ;;  %v169_v10 = vunpack.c.h.bf16 %v234_v2  ;;  %v238_v36 = vld [vmem:[%s351_s0 + $0x28] sm:$0xff]  }
   0x3   :  { %v164_v3 = vunpack.c.l.bf16 %v163_v1  ;;  %v165_v4 = vunpack.c.h.bf16 %v163_v1  ;;  %v172_v11 = vunpack.c.l.bf16 %v235_v7  ;;  %v173_v12 = vunpack.c.h.bf16 %v235_v7  ;;  %v237_v35 = vld [vmem:[%s351_s0 + $0x20] sm:$0xff]   ;;  %v239_v49 = vld [vmem:[%s351_s0 + $0x30] sm:$0xff]  }
   0x4   :  { %v176_v15 = vunpack.c.l.bf16 %v236_v8  ;;  %v177_v16 = vunpack.c.h.bf16 %v236_v8  ;;  %v47_v17 = vmul.f32 %v168_v9, %v272_v5  ;;  %v48_v18 = vmul.f32 %v169_v10, %v272_v5 }
   0x5   :  { %v45_v13 = vmul.f32 %v164_v3, %v272_v5  ;;  %v46_v14 = vmul.f32 %v165_v4, %v272_v5  ;;  %v49_v19 = vmul.f32 %v172_v11, %v272_v5  ;;  %v50_v20 = vmul.f32 %v173_v12, %v272_v5  ;;  %v240_v4 = vld [vmem:[%s351_s0 + $0x38] sm:$0xff]  }
   0x6   :  { %v51_v23 = vmul.f32 %v176_v15, %v272_v5  ;;  %v52_v24 = vmul.f32 %v177_v16, %v272_v5  ;;  %v64_v25 = vadd.f32 %v274_v6, %v47_v17  ;;  %v65_v26 = vadd.f32 %v274_v6, %v48_v18 }
   0x7   :  { %v62_v21 = vadd.f32 %v274_v6, %v45_v13  ;;  %v63_v22 = vadd.f32 %v274_v6, %v46_v14  ;;  %v66_v27 = vadd.f32 %v274_v6, %v49_v19  ;;  %v67_v28 = vadd.f32 %v274_v6, %v50_v20 }
   0x8   :  { %vm80_vm2 = vcmp.ge.f32.partialorder %v64_v25, 0.0  ;;  %vm81_vm3 = vcmp.ge.f32.partialorder %v65_v26, 0.0  ;;  %v96_v31 = vmul.f32 0.01, %v64_v25  ;;  %v97_v32 = vmul.f32 0.01, %v65_v26 }
   0x9   :  { %vm78_vm0 = vcmp.ge.f32.partialorder %v62_v21, 0.0  ;;  %vm79_vm1 = vcmp.ge.f32.partialorder %v63_v22, 0.0  ;;  %v94_v29 = vmul.f32 0.01, %v62_v21  ;;  %v95_v30 = vmul.f32 0.01, %v63_v22 }
   0xa   :  { %vm82_vm4 = vcmp.ge.f32.partialorder %v66_v27, 0.0  ;;  %vm83_vm5 = vcmp.ge.f32.partialorder %v67_v28, 0.0  ;;  %v112_v38 = vsel %vm80_vm2, %v64_v25, %v96_v31  ;;  %v113_v39 = vsel %vm81_vm3, %v65_v26, %v97_v32 }
   0xb   :  { %v110_v33 = vsel %vm78_vm0, %v62_v21, %v94_v29  ;;  %v111_v34 = vsel %vm79_vm1, %v63_v22, %v95_v30  ;;  %v98_v40 = vmul.f32 0.01, %v66_v27  ;;  %v202_v41 = vpack.c.bf16 %v113_v39, %v112_v38 }
   0xc   :  { %v197_v37 = vpack.c.bf16 %v111_v34, %v110_v33  ;;  %v99_v42 = vmul.f32 0.01, %v67_v28  ;;  %v68_v43 = vadd.f32 %v274_v6, %v51_v23  ;;  %v69_v44 = vadd.f32 %v274_v6, %v52_v24 }
   0xd   :  { %v114_v45 = vsel %vm82_vm4, %v66_v27, %v98_v40  ;;  %v180_v46 = vunpack.c.l.bf16 %v237_v35  ;;  %v181_v47 = vunpack.c.h.bf16 %v237_v35  ;;  %v184_v48 = vunpack.c.l.bf16 %v238_v36  ;;  %241 = vst [vmem:[%s353_s2 + $0x8] sm:$0xff] %v202_v41  }
   0xe   :  { %198 = vst [vmem:[%s353_s2] sm:$0xff] %v197_v37   ;;  %v115_v50 = vsel %vm83_vm5, %v67_v28, %v99_v42  ;;  %vm84_vm6 = vcmp.ge.f32.partialorder %v68_v43, 0.0  ;;  %vm85_vm7 = vcmp.ge.f32.partialorder %v69_v44, 0.0  ;;  %v100_v51 = vmul.f32 0.01, %v68_v43 }
   0xf   :  { %v207_v52 = vpack.c.bf16 %v115_v50, %v114_v45  ;;  %v101_v53 = vmul.f32 0.01, %v69_v44  ;;  %v53_v54 = vmul.f32 %v180_v46, %v272_v5  ;;  %v54_v55 = vmul.f32 %v181_v47, %v272_v5 }
  0x10   :  { %v116_v56 = vsel %vm84_vm6, %v68_v43, %v100_v51  ;;  %v185_v57 = vunpack.c.h.bf16 %v238_v36  ;;  %v55_v58 = vmul.f32 %v184_v48, %v272_v5  ;;  %v188_v59 = vunpack.c.l.bf16 %v239_v49 }
  0x11   :  { %242 = vst [vmem:[%s353_s2 + $0x10] sm:$0xff] %v207_v52   ;;  %v117_v60 = vsel %vm85_vm7, %v69_v44, %v101_v53  ;;  %v70_v61 = vadd.f32 %v274_v6, %v53_v54  ;;  %v71_v62 = vadd.f32 %v274_v6, %v54_v55  ;;  %v189_v63 = vunpack.c.h.bf16 %v239_v49 }
  0x12   :  { %v212_v0 = vpack.c.bf16 %v117_v60, %v116_v56  ;;  %v56_v1 = vmul.f32 %v185_v57, %v272_v5  ;;  %v72_v2 = vadd.f32 %v274_v6, %v55_v58  ;;  %v57_v3 = vmul.f32 %v188_v59, %v272_v5 }
  0x13   :  { %vm86_vm8 = vcmp.ge.f32.partialorder %v70_v61, 0.0  ;;  %vm87_vm9 = vcmp.ge.f32.partialorder %v71_v62, 0.0  ;;  %v102_v7 = vmul.f32 0.01, %v70_v61  ;;  %v103_v8 = vmul.f32 0.01, %v71_v62 }
  0x14   :  { %243 = vst [vmem:[%s353_s2 + $0x18] sm:$0xff] %v212_v0   ;;  %v73_v9 = vadd.f32 %v274_v6, %v56_v1  ;;  %vm88_vm10 = vcmp.ge.f32.partialorder %v72_v2, 0.0  ;;  %v104_v10 = vmul.f32 0.01, %v72_v2  ;;  %v58_v11 = vmul.f32 %v189_v63, %v272_v5 }
  0x15   :  { %v118_v12 = vsel %vm86_vm8, %v70_v61, %v102_v7  ;;  %v119_v13 = vsel %vm87_vm9, %v71_v62, %v103_v8  ;;  %v74_v14 = vadd.f32 %v274_v6, %v57_v3  ;;  %v192_v15 = vunpack.c.l.bf16 %v240_v4 }
  0x16   :  { %v217_v16 = vpack.c.bf16 %v119_v13, %v118_v12  ;;  %vm89_vm11 = vcmp.ge.f32.partialorder %v73_v9, 0.0  ;;  %v105_v17 = vmul.f32 0.01, %v73_v9  ;;  %v120_v18 = vsel %vm88_vm10, %v72_v2, %v104_v10 }
  0x17   :  { %v75_v19 = vadd.f32 %v274_v6, %v58_v11  ;;  %vm90_vm12 = vcmp.ge.f32.partialorder %v74_v14, 0.0  ;;  %v106_v20 = vmul.f32 0.01, %v74_v14  ;;  %v193_v21 = vunpack.c.h.bf16 %v240_v4 }
  0x18   :  { %244 = vst [vmem:[%s353_s2 + $0x20] sm:$0xff] %v217_v16   ;;  %v121_v22 = vsel %vm89_vm11, %v73_v9, %v105_v17  ;;  %v59_v23 = vmul.f32 %v192_v15, %v272_v5 }
  0x19   :  { %v222_v24 = vpack.c.bf16 %v121_v22, %v120_v18  ;;  %vm91_vm13 = vcmp.ge.f32.partialorder %v75_v19, 0.0  ;;  %v107_v25 = vmul.f32 0.01, %v75_v19  ;;  %v122_v26 = vsel %vm90_vm12, %v74_v14, %v106_v20 }
  0x1a   :  { %v60_v27 = vmul.f32 %v193_v21, %v272_v5  ;;  %v76_v28 = vadd.f32 %v274_v6, %v59_v23 }
  0x1b   :  { %245 = vst [vmem:[%s353_s2 + $0x28] sm:$0xff] %v222_v24   ;;  %v123_v29 = vsel %vm91_vm13, %v75_v19, %v107_v25 }
  0x1c   :  { %v227_v30 = vpack.c.bf16 %v123_v29, %v122_v26  ;;  %v77_v31 = vadd.f32 %v274_v6, %v60_v27  ;;  %vm92_vm14 = vcmp.ge.f32.partialorder %v76_v28, 0.0  ;;  %v108_v32 = vmul.f32 0.01, %v76_v28 }
  0x1e   :  { %246 = vst [vmem:[%s353_s2 + $0x30] sm:$0xff] %v227_v30   ;;  %vm93_vm15 = vcmp.ge.f32.partialorder %v77_v31, 0.0  ;;  %v109_v33 = vmul.f32 0.01, %v77_v31  ;;  %v124_v34 = vsel %vm92_vm14, %v76_v28, %v108_v32 }
  0x20   :  { %v125_v5 = vsel %vm93_vm15, %v77_v31, %v109_v33 }
  0x21   :  { %v232_v35 = vpack.c.bf16 %v125_v5, %v124_v34 }
  0x23   :  { %247 = vst [vmem:[%s353_s2 + $0x38] sm:$0xff] %v232_v35  }

// kernel: basic_block_forward.5
= control target key start
LH: loop header
LB: loop body
LE: loop exit
PB: predicated region body
PF: predicated region fallthrough
CT: control target
= control target key end

     0   :  { %vm116_vm0 = vcmask 1041408   ;;  %vm91_vm1 = vcmask 293888   ;;  %s488_s1 = inlined_call_operand.vmem [shape: bf16[36,128], index: 1, kind: input, shape index: {}]   ;;  %s489_s0 = inlined_call_operand.vmem [shape: bf16[128,36], index: 0, kind: input, shape index: {}]   ;;  %s490_s2 = inlined_call_operand.vmem [shape: bf16[128,128], index: 2, kind: output, shape index: {0}]   ;;  %s491_s3 = inlined_call_operand.vmem [shape: f32[8,128], index: 3, kind: output, shape index: {1}]   ;;  %s492_s4 = inlined_call_operand.vmem [shape: f32[8,128], index: 4, kind: output, shape index: {2}]  }
   0x1   :  { %v35_v0 = vld [vmem:[%s488_s1 + $0x10] sm:$0x3]  ;;  %v328_v4 = vld [vmem:[%s488_s1 + $0x8] sm:$0xff]  ;;  %v327_v5 = vld [vmem:[%s488_s1] sm:$0xff] }
   0x2   :  { %v85_v1 = vunpack.c.l.b16 %v35_v0  ;;  %v319_v6 = vld [vmem:[%s489_s0] sm:$0xff]  ;;  %v321_v7 = vld [vmem:[%s489_s0 + $0x10] sm:$0xff]  ;;  %v320_v10 = vld [vmem:[%s489_s0 + $0x8] sm:$0xff] }
   0x3   :  { %v323_v8 = vld [vmem:[%s489_s0 + $0x20] sm:$0xff]  ;;  %v325_v9 = vld [vmem:[%s489_s0 + $0x30] sm:$0xff]  ;;  %v322_v11 = vld [vmem:[%s489_s0 + $0x18] sm:$0xff] }
   0x4   :  { %v88_v2 = vpack.c.b16 %v85_v1, %v85_v1  ;;  %v324_v12 = vld [vmem:[%s489_s0 + $0x28] sm:$0xff]  ;;  %v326_v13 = vld [vmem:[%s489_s0 + $0x38] sm:$0xff] }
   0x6   :  { %v118_v3 = vsel %vm116_vm0, %v88_v2, 0 }
   0x7   :  { %125 = vmatpush.bf16.msra.mxu0 %v118_v3  ;;  %376 = vmatpush.bf16.msra.mxu1 %v118_v3 }
   0x8   :  { %377 = vmatpush.bf16.msra.mxu2 %v118_v3  ;;  %378 = vmatpush.bf16.msra.mxu3 %v118_v3 }
   0xb   :  { %126 = vmatpush.bf16.msra.mxu0 %v328_v4  ;;  %379 = vmatpush.bf16.msra.mxu1 %v328_v4 }
   0xc   :  { %380 = vmatpush.bf16.msra.mxu2 %v328_v4  ;;  %381 = vmatpush.bf16.msra.mxu3 %v328_v4 }
   0xf   :  { %127 = vmatpush.bf16.msra.mxu0 %v327_v5  ;;  %382 = vmatpush.bf16.msra.mxu1 %v327_v5 }
  0x10   :  { %383 = vmatpush.bf16.msra.mxu2 %v327_v5  ;;  %384 = vmatpush.bf16.msra.mxu3 %v327_v5 }
  0x12   :  { %311 = vmatmul.msk.bf16.vlgmr.msra.gmra.mxu0 %vm91_vm1, %v319_v6  ;;  %313 = vmatmul.msk.bf16.vlgmr.msra.gmra.mxu1 %vm91_vm1, %v321_v7 }
  0x13   :  { %315 = vmatmul.msk.bf16.vlgmr.msra.gmra.mxu2 %vm91_vm1, %v323_v8  ;;  %317 = vmatmul.msk.bf16.vlgmr.msra.gmra.mxu3 %vm91_vm1, %v325_v9 }
  0x22   :  { %312 = vmatmul.msk.bf16.gmra.mxu0 %vm91_vm1, %v320_v10  ;;  %314 = vmatmul.msk.bf16.gmra.mxu1 %vm91_vm1, %v322_v11 }
  0x23   :  { %316 = vmatmul.msk.bf16.gmra.mxu2 %vm91_vm1, %v324_v12  ;;  %318 = vmatmul.msk.bf16.gmra.mxu3 %vm91_vm1, %v326_v13 }
  0x8f   :  { %v129_v14 = vpop.f32.mrf.mxu0  ;;  %v139_v15 = vpop.f32.mrf.mxu1 }
  0x90   :  { %v226_v29 = vmul.f32 %v129_v14, %v129_v14  ;;  %v230_v43 = vmul.f32 %v139_v15, %v139_v15 }
  0x96   :  { %v149_v16 = vpop.f32.mrf.mxu2  ;;  %v452_v17 = vpop.f32.mrf.mxu3 }
  0x97   :  { %v131_v18 = vpop.f32.mrf.mxu0  ;;  %v141_v19 = vpop.f32.mrf.mxu1  ;;  %v234_v59 = vmul.f32 %v149_v16, %v149_v16  ;;  %v238_v7 = vmul.f32 %v452_v17, %v452_v17 }
  0x98   :  { %v332_v20 = vpack.c.bf16 %v131_v18, %v129_v14  ;;  %v342_v21 = vpack.c.bf16 %v141_v19, %v139_v15  ;;  %v227_v28 = vmul.f32 %v131_v18, %v131_v18  ;;  %v208_v31 = vadd.f32 %v131_v18, %v129_v14 }
  0x99   :  { %v231_v46 = vmul.f32 %v141_v19, %v141_v19 }
  0x9a   :  { %333 = vst [vmem:[%s490_s2] sm:$0xff] %v332_v20   ;;  %v242_v32 = vadd.f32 %v227_v28, %v226_v29 }
  0x9b   :  { %370 = vst [vmem:[%s490_s2 + $0x10] sm:$0xff] %v342_v21  }
  0x9e   :  { %v151_v22 = vpop.f32.mrf.mxu2  ;;  %v161_v23 = vpop.f32.mrf.mxu3 }
  0x9f   :  { %v134_v24 = vpop.f32.mrf.mxu0  ;;  %v144_v25 = vpop.f32.mrf.mxu1  ;;  %v352_v26 = vpack.c.bf16 %v151_v22, %v149_v16  ;;  %v362_v27 = vpack.c.bf16 %v161_v23, %v452_v17  ;;  %v235_v62 = vmul.f32 %v151_v22, %v151_v22  ;;  %v239_v10 = vmul.f32 %v161_v23, %v161_v23 }
  0xa0   :  { %v228_v30 = vmul.f32 %v134_v24, %v134_v24  ;;  %v209_v33 = vadd.f32 %v208_v31, %v134_v24  ;;  %v232_v49 = vmul.f32 %v144_v25, %v144_v25 }
  0xa1   :  { %372 = vst [vmem:[%s490_s2 + $0x20] sm:$0xff] %v352_v26  }
  0xa2   :  { %374 = vst [vmem:[%s490_s2 + $0x30] sm:$0xff] %v362_v27   ;;  %v243_v36 = vadd.f32 %v242_v32, %v228_v30 }
  0xa6   :  { %v154_v34 = vpop.f32.mrf.mxu2  ;;  %v164_v35 = vpop.f32.mrf.mxu3 }
  0xa7   :  { %v136_v37 = vpop.f32.mrf.mxu0  ;;  %v146_v38 = vpop.f32.mrf.mxu1  ;;  %v236_v2 = vmul.f32 %v154_v34, %v154_v34  ;;  %v240_v14 = vmul.f32 %v164_v35, %v164_v35 }
  0xa8   :  { %v337_v39 = vpack.c.bf16 %v136_v37, %v134_v24  ;;  %v210_v40 = vadd.f32 %v209_v33, %v136_v37  ;;  %v229_v41 = vmul.f32 %v136_v37, %v136_v37  ;;  %v347_v42 = vpack.c.bf16 %v146_v38, %v144_v25 }
  0xa9   :  { %v233_v57 = vmul.f32 %v146_v38, %v146_v38 }
  0xaa   :  { %369 = vst [vmem:[%s490_s2 + $0x8] sm:$0xff] %v337_v39   ;;  %v211_v44 = vadd.f32 %v210_v40, %v139_v15  ;;  %v244_v45 = vadd.f32 %v243_v36, %v229_v41 }
  0xab   :  { %371 = vst [vmem:[%s490_s2 + $0x18] sm:$0xff] %v347_v42  }
  0xac   :  { %v245_v47 = vadd.f32 %v244_v45, %v230_v43  ;;  %v212_v48 = vadd.f32 %v211_v44, %v141_v19 }
  0xae   :  { %v213_v50 = vadd.f32 %v212_v48, %v144_v25  ;;  %v246_v51 = vadd.f32 %v245_v47, %v231_v46  ;;  %v156_v52 = vpop.f32.mrf.mxu2  ;;  %v166_v53 = vpop.f32.mrf.mxu3 }
  0xaf   :  { %v357_v54 = vpack.c.bf16 %v156_v52, %v154_v34  ;;  %v367_v55 = vpack.c.bf16 %v166_v53, %v164_v35  ;;  %v237_v6 = vmul.f32 %v156_v52, %v156_v52  ;;  %v241_v19 = vmul.f32 %v166_v53, %v166_v53 }
  0xb0   :  { %v214_v56 = vadd.f32 %v213_v50, %v146_v38  ;;  %v247_v58 = vadd.f32 %v246_v51, %v232_v49 }
  0xb1   :  { %373 = vst [vmem:[%s490_s2 + $0x28] sm:$0xff] %v357_v54  }
  0xb2   :  { %v215_v60 = vadd.f32 %v214_v56, %v149_v16  ;;  %v248_v61 = vadd.f32 %v247_v58, %v233_v57  ;;  %375 = vst [vmem:[%s490_s2 + $0x38] sm:$0xff] %v367_v55  }
  0xb4   :  { %v249_v63 = vadd.f32 %v248_v61, %v234_v59  ;;  %v216_v0 = vadd.f32 %v215_v60, %v151_v22 }
  0xb6   :  { %v217_v1 = vadd.f32 %v216_v0, %v154_v34  ;;  %v250_v3 = vadd.f32 %v249_v63, %v235_v62 }
  0xb8   :  { %v251_v4 = vadd.f32 %v250_v3, %v236_v2  ;;  %v218_v5 = vadd.f32 %v217_v1, %v156_v52 }
  0xba   :  { %v219_v8 = vadd.f32 %v218_v5, %v452_v17  ;;  %v252_v9 = vadd.f32 %v251_v4, %v237_v6 }
  0xbc   :  { %v253_v11 = vadd.f32 %v252_v9, %v238_v7  ;;  %v220_v12 = vadd.f32 %v219_v8, %v161_v23 }
  0xbe   :  { %v221_v13 = vadd.f32 %v220_v12, %v164_v35  ;;  %v254_v15 = vadd.f32 %v253_v11, %v239_v10 }
  0xc0   :  { %v255_v16 = vadd.f32 %v254_v15, %v240_v14  ;;  %v222_v18 = vadd.f32 %v221_v13, %v166_v53 }
  0xc2   :  { %v256_v20 = vadd.f32 %v255_v16, %v241_v19  ;;  %224 = vst [vmem:[%s491_s3] sm:$0xff] %v222_v18 }
  0xc4   :  { %258 = vst [vmem:[%s492_s4] sm:$0xff] %v256_v20 }

// kernel: basic_block_forward.8
= control target key start
LH: loop header
LB: loop body
LE: loop exit
PB: predicated region body
PF: predicated region fallthrough
CT: control target
= control target key end

     0   :  { %vm132_vm0 = vcmask 1043456   ;;  %vm107_vm1 = vcmask 588800   ;;  %s526_s1 = inlined_call_operand.vmem [shape: bf16[72,128], index: 1, kind: input, shape index: {}]   ;;  %s527_s0 = inlined_call_operand.vmem [shape: bf16[128,72], index: 0, kind: input, shape index: {}]   ;;  %s528_s2 = inlined_call_operand.vmem [shape: bf16[128,128], index: 2, kind: output, shape index: {0}]   ;;  %s529_s3 = inlined_call_operand.vmem [shape: f32[8,128], index: 3, kind: output, shape index: {1}]   ;;  %s530_s4 = inlined_call_operand.vmem [shape: f32[8,128], index: 4, kind: output, shape index: {2}]  }
   0x1   :  { %v39_v0 = vld [vmem:[%s526_s1 + $0x20] sm:$0xf]  ;;  %v354_v4 = vld [vmem:[%s526_s1 + $0x18] sm:$0xff]  ;;  %v353_v5 = vld [vmem:[%s526_s1 + $0x10] sm:$0xff] }
   0x2   :  { %v97_v1 = vunpack.c.l.b16 %v39_v0  ;;  %v352_v6 = vld [vmem:[%s526_s1 + $0x8] sm:$0xff]  ;;  %v351_v7 = vld [vmem:[%s526_s1] sm:$0xff]  ;;  %v345_v9 = vld [vmem:[%s527_s0 + $0x10] sm:$0xff] }
   0x3   :  { %v343_v8 = vld [vmem:[%s527_s0] sm:$0xff]  ;;  %v349_v11 = vld [vmem:[%s527_s0 + $0x30] sm:$0xff]  ;;  %v344_v12 = vld [vmem:[%s527_s0 + $0x8] sm:$0xff] }
   0x4   :  { %v102_v2 = vpack.c.b16 %v97_v1, %v97_v1  ;;  %v347_v10 = vld [vmem:[%s527_s0 + $0x20] sm:$0xff]  ;;  %v346_v13 = vld [vmem:[%s527_s0 + $0x18] sm:$0xff]  ;;  %v348_v14 = vld [vmem:[%s527_s0 + $0x28] sm:$0xff] }
   0x5   :  { %v350_v15 = vld [vmem:[%s527_s0 + $0x38] sm:$0xff] }
   0x6   :  { %v134_v3 = vsel %vm132_vm0, %v102_v2, 0 }
   0x7   :  { %139 = vmatpush.bf16.msra.mxu0 %v134_v3  ;;  %402 = vmatpush.bf16.msra.mxu1 %v134_v3 }
   0x8   :  { %403 = vmatpush.bf16.msra.mxu2 %v134_v3  ;;  %404 = vmatpush.bf16.msra.mxu3 %v134_v3 }
   0xb   :  { %140 = vmatpush.bf16.msra.mxu0 %v354_v4  ;;  %405 = vmatpush.bf16.msra.mxu1 %v354_v4 }
   0xc   :  { %406 = vmatpush.bf16.msra.mxu2 %v354_v4  ;;  %407 = vmatpush.bf16.msra.mxu3 %v354_v4 }
   0xf   :  { %141 = vmatpush.bf16.msra.mxu0 %v353_v5  ;;  %408 = vmatpush.bf16.msra.mxu1 %v353_v5 }
  0x10   :  { %409 = vmatpush.bf16.msra.mxu2 %v353_v5  ;;  %410 = vmatpush.bf16.msra.mxu3 %v353_v5 }
  0x13   :  { %142 = vmatpush.bf16.msra.mxu0 %v352_v6  ;;  %411 = vmatpush.bf16.msra.mxu1 %v352_v6 }
  0x14   :  { %412 = vmatpush.bf16.msra.mxu2 %v352_v6  ;;  %413 = vmatpush.bf16.msra.mxu3 %v352_v6 }
  0x17   :  { %143 = vmatpush.bf16.msra.mxu0 %v351_v7  ;;  %414 = vmatpush.bf16.msra.mxu1 %v351_v7 }
  0x18   :  { %415 = vmatpush.bf16.msra.mxu2 %v351_v7  ;;  %416 = vmatpush.bf16.msra.mxu3 %v351_v7 }
  0x1a   :  { %335 = vmatmul.msk.bf16.vlgmr.msra.gmra.mxu0 %vm107_vm1, %v343_v8  ;;  %337 = vmatmul.msk.bf16.vlgmr.msra.gmra.mxu1 %vm107_vm1, %v345_v9 }
  0x1b   :  { %339 = vmatmul.msk.bf16.vlgmr.msra.gmra.mxu2 %vm107_vm1, %v347_v10  ;;  %341 = vmatmul.msk.bf16.vlgmr.msra.gmra.mxu3 %vm107_vm1, %v349_v11 }
  0x2a   :  { %336 = vmatmul.msk.bf16.gmra.mxu0 %vm107_vm1, %v344_v12  ;;  %338 = vmatmul.msk.bf16.gmra.mxu1 %vm107_vm1, %v346_v13 }
  0x2b   :  { %340 = vmatmul.msk.bf16.gmra.mxu2 %vm107_vm1, %v348_v14  ;;  %342 = vmatmul.msk.bf16.gmra.mxu3 %vm107_vm1, %v350_v15 }
  0x97   :  { %v145_v16 = vpop.f32.mrf.mxu0  ;;  %v155_v17 = vpop.f32.mrf.mxu1 }
  0x98   :  { %v242_v31 = vmul.f32 %v145_v16, %v145_v16  ;;  %v246_v45 = vmul.f32 %v155_v17, %v155_v17 }
  0x9e   :  { %v165_v18 = vpop.f32.mrf.mxu2  ;;  %v490_v19 = vpop.f32.mrf.mxu3 }
  0x9f   :  { %v147_v20 = vpop.f32.mrf.mxu0  ;;  %v157_v21 = vpop.f32.mrf.mxu1  ;;  %v250_v61 = vmul.f32 %v165_v18, %v165_v18  ;;  %v254_v9 = vmul.f32 %v490_v19, %v490_v19 }
  0xa0   :  { %v358_v22 = vpack.c.bf16 %v147_v20, %v145_v16  ;;  %v368_v23 = vpack.c.bf16 %v157_v21, %v155_v17  ;;  %v243_v30 = vmul.f32 %v147_v20, %v147_v20  ;;  %v224_v33 = vadd.f32 %v147_v20, %v145_v16 }
  0xa1   :  { %v247_v48 = vmul.f32 %v157_v21, %v157_v21 }
  0xa2   :  { %359 = vst [vmem:[%s528_s2] sm:$0xff] %v358_v22   ;;  %v258_v34 = vadd.f32 %v243_v30, %v242_v31 }
  0xa3   :  { %396 = vst [vmem:[%s528_s2 + $0x10] sm:$0xff] %v368_v23  }
  0xa6   :  { %v167_v24 = vpop.f32.mrf.mxu2  ;;  %v177_v25 = vpop.f32.mrf.mxu3 }
  0xa7   :  { %v150_v26 = vpop.f32.mrf.mxu0  ;;  %v160_v27 = vpop.f32.mrf.mxu1  ;;  %v378_v28 = vpack.c.bf16 %v167_v24, %v165_v18  ;;  %v388_v29 = vpack.c.bf16 %v177_v25, %v490_v19  ;;  %v251_v0 = vmul.f32 %v167_v24, %v167_v24  ;;  %v255_v12 = vmul.f32 %v177_v25, %v177_v25 }
  0xa8   :  { %v244_v32 = vmul.f32 %v150_v26, %v150_v26  ;;  %v225_v35 = vadd.f32 %v224_v33, %v150_v26  ;;  %v248_v51 = vmul.f32 %v160_v27, %v160_v27 }
  0xa9   :  { %398 = vst [vmem:[%s528_s2 + $0x20] sm:$0xff] %v378_v28  }
  0xaa   :  { %400 = vst [vmem:[%s528_s2 + $0x30] sm:$0xff] %v388_v29   ;;  %v259_v38 = vadd.f32 %v258_v34, %v244_v32 }
  0xae   :  { %v170_v36 = vpop.f32.mrf.mxu2  ;;  %v180_v37 = vpop.f32.mrf.mxu3 }
  0xaf   :  { %v152_v39 = vpop.f32.mrf.mxu0  ;;  %v162_v40 = vpop.f32.mrf.mxu1  ;;  %v252_v4 = vmul.f32 %v170_v36, %v170_v36  ;;  %v256_v16 = vmul.f32 %v180_v37, %v180_v37 }
  0xb0   :  { %v363_v41 = vpack.c.bf16 %v152_v39, %v150_v26  ;;  %v226_v42 = vadd.f32 %v225_v35, %v152_v39  ;;  %v245_v43 = vmul.f32 %v152_v39, %v152_v39  ;;  %v373_v44 = vpack.c.bf16 %v162_v40, %v160_v27 }
  0xb1   :  { %v249_v59 = vmul.f32 %v162_v40, %v162_v40 }
  0xb2   :  { %395 = vst [vmem:[%s528_s2 + $0x8] sm:$0xff] %v363_v41   ;;  %v227_v46 = vadd.f32 %v226_v42, %v155_v17  ;;  %v260_v47 = vadd.f32 %v259_v38, %v245_v43 }
  0xb3   :  { %397 = vst [vmem:[%s528_s2 + $0x18] sm:$0xff] %v373_v44  }
  0xb4   :  { %v261_v49 = vadd.f32 %v260_v47, %v246_v45  ;;  %v228_v50 = vadd.f32 %v227_v46, %v157_v21 }
  0xb6   :  { %v229_v52 = vadd.f32 %v228_v50, %v160_v27  ;;  %v262_v53 = vadd.f32 %v261_v49, %v247_v48  ;;  %v172_v54 = vpop.f32.mrf.mxu2  ;;  %v182_v55 = vpop.f32.mrf.mxu3 }
  0xb7   :  { %v383_v56 = vpack.c.bf16 %v172_v54, %v170_v36  ;;  %v393_v57 = vpack.c.bf16 %v182_v55, %v180_v37  ;;  %v253_v8 = vmul.f32 %v172_v54, %v172_v54  ;;  %v257_v21 = vmul.f32 %v182_v55, %v182_v55 }
  0xb8   :  { %v230_v58 = vadd.f32 %v229_v52, %v162_v40  ;;  %v263_v60 = vadd.f32 %v262_v53, %v248_v51 }
  0xb9   :  { %399 = vst [vmem:[%s528_s2 + $0x28] sm:$0xff] %v383_v56  }
  0xba   :  { %v231_v62 = vadd.f32 %v230_v58, %v165_v18  ;;  %v264_v63 = vadd.f32 %v263_v60, %v249_v59  ;;  %401 = vst [vmem:[%s528_s2 + $0x38] sm:$0xff] %v393_v57  }
  0xbc   :  { %v265_v1 = vadd.f32 %v264_v63, %v250_v61  ;;  %v232_v2 = vadd.f32 %v231_v62, %v167_v24 }
  0xbe   :  { %v233_v3 = vadd.f32 %v232_v2, %v170_v36  ;;  %v266_v5 = vadd.f32 %v265_v1, %v251_v0 }
  0xc0   :  { %v267_v6 = vadd.f32 %v266_v5, %v252_v4  ;;  %v234_v7 = vadd.f32 %v233_v3, %v172_v54 }
  0xc2   :  { %v235_v10 = vadd.f32 %v234_v7, %v490_v19  ;;  %v268_v11 = vadd.f32 %v267_v6, %v253_v8 }
  0xc4   :  { %v269_v13 = vadd.f32 %v268_v11, %v254_v9  ;;  %v236_v14 = vadd.f32 %v235_v10, %v177_v25 }
  0xc6   :  { %v237_v15 = vadd.f32 %v236_v14, %v180_v37  ;;  %v270_v17 = vadd.f32 %v269_v13, %v255_v12 }
  0xc8   :  { %v271_v18 = vadd.f32 %v270_v17, %v256_v16  ;;  %v238_v20 = vadd.f32 %v237_v15, %v182_v55 }
  0xca   :  { %v272_v22 = vadd.f32 %v271_v18, %v257_v21  ;;  %240 = vst [vmem:[%s529_s3] sm:$0xff] %v238_v20 }
  0xcc   :  { %274 = vst [vmem:[%s530_s4] sm:$0xff] %v272_v22 }

// kernel: basic_block_forward.7
= control target key start
LH: loop header
LB: loop body
LE: loop exit
PB: predicated region body
PF: predicated region fallthrough
CT: control target
= control target key end

     0   :  { %vm79_vm0 = vcmask 130048   ;;  %s455_s1 = inlined_call_operand.vmem [shape: bf16[16,128], index: 1, kind: input, shape index: {}]   ;;  %s456_s0 = inlined_call_operand.vmem [shape: bf16[128,16], index: 0, kind: input, shape index: {}]   ;;  %s457_s2 = inlined_call_operand.vmem [shape: bf16[128,128], index: 2, kind: output, shape index: {0}]   ;;  %s458_s3 = inlined_call_operand.vmem [shape: f32[8,128], index: 3, kind: output, shape index: {1}]   ;;  %s459_s4 = inlined_call_operand.vmem [shape: f32[8,128], index: 4, kind: output, shape index: {2}]  }
   0x1   :  { %v307_v0 = vld [vmem:[%s455_s1] sm:$0xff]  ;;  %v301_v2 = vld [vmem:[%s456_s0 + $0x10] sm:$0xff]  ;;  %v300_v5 = vld [vmem:[%s456_s0 + $0x8] sm:$0xff] }
   0x2   :  { %v299_v1 = vld [vmem:[%s456_s0] sm:$0xff]  ;;  %111 = vmatpush.bf16.msra.mxu0 %v307_v0  ;;  %355 = vmatpush.bf16.msra.mxu1 %v307_v0  ;;  %v305_v4 = vld [vmem:[%s456_s0 + $0x30] sm:$0xff]  ;;  %v302_v6 = vld [vmem:[%s456_s0 + $0x18] sm:$0xff] }
   0x3   :  { %v303_v3 = vld [vmem:[%s456_s0 + $0x20] sm:$0xff]  ;;  %356 = vmatpush.bf16.msra.mxu2 %v307_v0  ;;  %357 = vmatpush.bf16.msra.mxu3 %v307_v0  ;;  %v304_v7 = vld [vmem:[%s456_s0 + $0x28] sm:$0xff]  ;;  %v306_v8 = vld [vmem:[%s456_s0 + $0x38] sm:$0xff] }
   0x5   :  { %291 = vmatmul.msk.bf16.vlgmr.msra.gmra.mxu0 %vm79_vm0, %v299_v1  ;;  %293 = vmatmul.msk.bf16.vlgmr.msra.gmra.mxu1 %vm79_vm0, %v301_v2 }
   0x6   :  { %295 = vmatmul.msk.bf16.vlgmr.msra.gmra.mxu2 %vm79_vm0, %v303_v3  ;;  %297 = vmatmul.msk.bf16.vlgmr.msra.gmra.mxu3 %vm79_vm0, %v305_v4 }
  0x15   :  { %292 = vmatmul.msk.bf16.gmra.mxu0 %vm79_vm0, %v300_v5  ;;  %294 = vmatmul.msk.bf16.gmra.mxu1 %vm79_vm0, %v302_v6 }
  0x16   :  { %296 = vmatmul.msk.bf16.gmra.mxu2 %vm79_vm0, %v304_v7  ;;  %298 = vmatmul.msk.bf16.gmra.mxu3 %vm79_vm0, %v306_v8 }
  0x82   :  { %v113_v9 = vpop.f32.mrf.mxu0  ;;  %v123_v10 = vpop.f32.mrf.mxu1 }
  0x83   :  { %v210_v24 = vmul.f32 %v113_v9, %v113_v9  ;;  %v214_v38 = vmul.f32 %v123_v10, %v123_v10 }
  0x89   :  { %v133_v11 = vpop.f32.mrf.mxu2  ;;  %v419_v12 = vpop.f32.mrf.mxu3 }
  0x8a   :  { %v115_v13 = vpop.f32.mrf.mxu0  ;;  %v125_v14 = vpop.f32.mrf.mxu1  ;;  %v218_v54 = vmul.f32 %v133_v11, %v133_v11  ;;  %v222_v2 = vmul.f32 %v419_v12, %v419_v12 }
  0x8b   :  { %v311_v15 = vpack.c.bf16 %v115_v13, %v113_v9  ;;  %v321_v16 = vpack.c.bf16 %v125_v14, %v123_v10  ;;  %v211_v23 = vmul.f32 %v115_v13, %v115_v13  ;;  %v192_v26 = vadd.f32 %v115_v13, %v113_v9 }
  0x8c   :  { %v215_v41 = vmul.f32 %v125_v14, %v125_v14 }
  0x8d   :  { %312 = vst [vmem:[%s457_s2] sm:$0xff] %v311_v15   ;;  %v226_v27 = vadd.f32 %v211_v23, %v210_v24 }
  0x8e   :  { %349 = vst [vmem:[%s457_s2 + $0x10] sm:$0xff] %v321_v16  }
  0x91   :  { %v135_v17 = vpop.f32.mrf.mxu2  ;;  %v145_v18 = vpop.f32.mrf.mxu3 }
  0x92   :  { %v118_v19 = vpop.f32.mrf.mxu0  ;;  %v128_v20 = vpop.f32.mrf.mxu1  ;;  %v331_v21 = vpack.c.bf16 %v135_v17, %v133_v11  ;;  %v341_v22 = vpack.c.bf16 %v145_v18, %v419_v12  ;;  %v219_v57 = vmul.f32 %v135_v17, %v135_v17  ;;  %v223_v5 = vmul.f32 %v145_v18, %v145_v18 }
  0x93   :  { %v212_v25 = vmul.f32 %v118_v19, %v118_v19  ;;  %v193_v28 = vadd.f32 %v192_v26, %v118_v19  ;;  %v216_v44 = vmul.f32 %v128_v20, %v128_v20 }
  0x94   :  { %351 = vst [vmem:[%s457_s2 + $0x20] sm:$0xff] %v331_v21  }
  0x95   :  { %353 = vst [vmem:[%s457_s2 + $0x30] sm:$0xff] %v341_v22   ;;  %v227_v31 = vadd.f32 %v226_v27, %v212_v25 }
  0x99   :  { %v138_v29 = vpop.f32.mrf.mxu2  ;;  %v148_v30 = vpop.f32.mrf.mxu3 }
  0x9a   :  { %v120_v32 = vpop.f32.mrf.mxu0  ;;  %v130_v33 = vpop.f32.mrf.mxu1  ;;  %v220_v61 = vmul.f32 %v138_v29, %v138_v29  ;;  %v224_v9 = vmul.f32 %v148_v30, %v148_v30 }
  0x9b   :  { %v316_v34 = vpack.c.bf16 %v120_v32, %v118_v19  ;;  %v194_v35 = vadd.f32 %v193_v28, %v120_v32  ;;  %v213_v36 = vmul.f32 %v120_v32, %v120_v32  ;;  %v326_v37 = vpack.c.bf16 %v130_v33, %v128_v20 }
  0x9c   :  { %v217_v52 = vmul.f32 %v130_v33, %v130_v33 }
  0x9d   :  { %348 = vst [vmem:[%s457_s2 + $0x8] sm:$0xff] %v316_v34   ;;  %v195_v39 = vadd.f32 %v194_v35, %v123_v10  ;;  %v228_v40 = vadd.f32 %v227_v31, %v213_v36 }
  0x9e   :  { %350 = vst [vmem:[%s457_s2 + $0x18] sm:$0xff] %v326_v37  }
  0x9f   :  { %v229_v42 = vadd.f32 %v228_v40, %v214_v38  ;;  %v196_v43 = vadd.f32 %v195_v39, %v125_v14 }
  0xa1   :  { %v197_v45 = vadd.f32 %v196_v43, %v128_v20  ;;  %v230_v46 = vadd.f32 %v229_v42, %v215_v41  ;;  %v140_v47 = vpop.f32.mrf.mxu2  ;;  %v150_v48 = vpop.f32.mrf.mxu3 }
  0xa2   :  { %v336_v49 = vpack.c.bf16 %v140_v47, %v138_v29  ;;  %v346_v50 = vpack.c.bf16 %v150_v48, %v148_v30  ;;  %v221_v1 = vmul.f32 %v140_v47, %v140_v47  ;;  %v225_v14 = vmul.f32 %v150_v48, %v150_v48 }
  0xa3   :  { %v198_v51 = vadd.f32 %v197_v45, %v130_v33  ;;  %v231_v53 = vadd.f32 %v230_v46, %v216_v44 }
  0xa4   :  { %352 = vst [vmem:[%s457_s2 + $0x28] sm:$0xff] %v336_v49  }
  0xa5   :  { %v199_v55 = vadd.f32 %v198_v51, %v133_v11  ;;  %v232_v56 = vadd.f32 %v231_v53, %v217_v52  ;;  %354 = vst [vmem:[%s457_s2 + $0x38] sm:$0xff] %v346_v50  }
  0xa7   :  { %v233_v58 = vadd.f32 %v232_v56, %v218_v54  ;;  %v200_v59 = vadd.f32 %v199_v55, %v135_v17 }
  0xa9   :  { %v201_v60 = vadd.f32 %v200_v59, %v138_v29  ;;  %v234_v62 = vadd.f32 %v233_v58, %v219_v57 }
  0xab   :  { %v235_v63 = vadd.f32 %v234_v62, %v220_v61  ;;  %v202_v0 = vadd.f32 %v201_v60, %v140_v47 }
  0xad   :  { %v203_v3 = vadd.f32 %v202_v0, %v419_v12  ;;  %v236_v4 = vadd.f32 %v235_v63, %v221_v1 }
  0xaf   :  { %v237_v6 = vadd.f32 %v236_v4, %v222_v2  ;;  %v204_v7 = vadd.f32 %v203_v3, %v145_v18 }
  0xb1   :  { %v205_v8 = vadd.f32 %v204_v7, %v148_v30  ;;  %v238_v10 = vadd.f32 %v237_v6, %v223_v5 }
  0xb3   :  { %v239_v11 = vadd.f32 %v238_v10, %v224_v9  ;;  %v206_v13 = vadd.f32 %v205_v8, %v150_v48 }
  0xb5   :  { %v240_v15 = vadd.f32 %v239_v11, %v225_v14  ;;  %208 = vst [vmem:[%s458_s3] sm:$0xff] %v206_v13 }
  0xb7   :  { %242 = vst [vmem:[%s459_s4] sm:$0xff] %v240_v15 }

// kernel: basic_block_forward.9
= control target key start
LH: loop header
LB: loop body
LE: loop exit
PB: predicated region body
PF: predicated region fallthrough
CT: control target
= control target key end

     0   :  { %s551_s0 = inlined_call_operand.vmem [shape: bf16[128,128], index: 0, kind: input, shape index: {}]   ;;  %s552_s1 = inlined_call_operand.vmem [shape: f32[2,128], index: 1, kind: input, shape index: {}]   ;;  %s553_s2 = inlined_call_operand.vmem [shape: bf16[128,128], index: 2, kind: input, shape index: {}]   ;;  %s554_s3 = inlined_call_operand.vmem [shape: f32[2,128], index: 3, kind: input, shape index: {}]   ;;  %s555_s4 = inlined_call_operand.vmem [shape: bf16[128,128], index: 4, kind: output, shape index: {}]  }
   0x1   :  { %v17_v0 = vld [vmem:[%s552_s1] sm:$0x3]  ;;  %v355_v8 = vld [vmem:[%s551_s0 + $0x8] sm:$0xff]   ;;  %v356_v18 = vld [vmem:[%s551_s0 + $0x10] sm:$0xff]  }
   0x2   :  { %v252_v1 = vld [vmem:[%s551_s0] sm:$0xff]   ;;  %v410_v5 = vperm.slane %v17_v0, 0  ;;  %v412_v6 = vperm.slane %v17_v0, 1  ;;  %v362_v9 = vld [vmem:[%s553_s2 + $0x8] sm:$0xff]   ;;  %v257_v16 = vunpack.c.l.bf16 %v355_v8  ;;  %v258_v17 = vunpack.c.h.bf16 %v355_v8  ;;  %v363_v27 = vld [vmem:[%s553_s2 + $0x10] sm:$0xff]  }
   0x3   :  { %v84_v2 = vld [vmem:[%s554_s3] sm:$0x3]  ;;  %v253_v3 = vunpack.c.l.bf16 %v252_v1  ;;  %v254_v4 = vunpack.c.h.bf16 %v252_v1  ;;  %v289_v21 = vunpack.c.l.bf16 %v362_v9  ;;  %v290_v22 = vunpack.c.h.bf16 %v362_v9  ;;  %v357_v48 = vld [vmem:[%s551_s0 + $0x18] sm:$0xff]  }
   0x4   :  { %v284_v7 = vld [vmem:[%s553_s2] sm:$0xff]   ;;  %v423_v12 = vperm.slane %v84_v2, 0  ;;  %v425_v13 = vperm.slane %v84_v2, 1  ;;  %v53_v25 = vmul.f32 %v257_v16, %v410_v5  ;;  %v54_v26 = vmul.f32 %v258_v17, %v410_v5  ;;  %v364_v59 = vld [vmem:[%s553_s2 + $0x18] sm:$0xff]  }
   0x5   :  { %v285_v10 = vunpack.c.l.bf16 %v284_v7  ;;  %v286_v11 = vunpack.c.h.bf16 %v284_v7  ;;  %v51_v14 = vmul.f32 %v253_v3, %v410_v5  ;;  %v52_v15 = vmul.f32 %v254_v4, %v410_v5  ;;  %v358_v8 = vld [vmem:[%s551_s0 + $0x20] sm:$0xff]  }
   0x6   :  { %v120_v28 = vmul.f32 %v289_v21, %v423_v12  ;;  %v121_v29 = vmul.f32 %v290_v22, %v423_v12  ;;  %v261_v30 = vunpack.c.l.bf16 %v356_v18  ;;  %v262_v31 = vunpack.c.h.bf16 %v356_v18  ;;  %v359_v22 = vld [vmem:[%s551_s0 + $0x28] sm:$0xff]  }
   0x7   :  { %v118_v19 = vmul.f32 %v285_v10, %v423_v12  ;;  %v119_v20 = vmul.f32 %v286_v11, %v423_v12  ;;  %v68_v23 = vadd.f32 %v412_v6, %v51_v14  ;;  %v69_v24 = vadd.f32 %v412_v6, %v52_v15  ;;  %v365_v11 = vld [vmem:[%s553_s2 + $0x20] sm:$0xff]  }
   0x8   :  { %v70_v34 = vadd.f32 %v412_v6, %v53_v25  ;;  %v71_v35 = vadd.f32 %v412_v6, %v54_v26  ;;  %v55_v36 = vmul.f32 %v261_v30, %v410_v5  ;;  %v56_v37 = vmul.f32 %v262_v31, %v410_v5  ;;  %v366_v31 = vld [vmem:[%s553_s2 + $0x28] sm:$0xff]  }
   0x9   :  { %v134_v32 = vadd.f32 %v118_v19, %v68_v23  ;;  %v135_v33 = vadd.f32 %v119_v20, %v69_v24  ;;  %v293_v38 = vunpack.c.l.bf16 %v363_v27  ;;  %v294_v39 = vunpack.c.h.bf16 %v363_v27 }
   0xa   :  { %v136_v42 = vadd.f32 %v120_v28, %v70_v34  ;;  %v137_v43 = vadd.f32 %v121_v29, %v71_v35  ;;  %v72_v44 = vadd.f32 %v412_v6, %v55_v36  ;;  %v73_v45 = vadd.f32 %v412_v6, %v56_v37 }
   0xb   :  { %v151_v40 = vadd.f32 %v425_v13, %v134_v32  ;;  %v152_v41 = vadd.f32 %v425_v13, %v135_v33  ;;  %v122_v46 = vmul.f32 %v293_v38, %v423_v12  ;;  %v123_v47 = vmul.f32 %v294_v39, %v423_v12 }
   0xc   :  { %v153_v51 = vadd.f32 %v425_v13, %v136_v42  ;;  %v154_v52 = vadd.f32 %v425_v13, %v137_v43  ;;  %v265_v57 = vunpack.c.l.bf16 %v357_v48  ;;  %v266_v58 = vunpack.c.h.bf16 %v357_v48 }
   0xd   :  { %vm167_vm0 = vcmp.ge.f32.partialorder %v151_v40, 0.0  ;;  %vm168_vm1 = vcmp.ge.f32.partialorder %v152_v41, 0.0  ;;  %v183_v49 = vmul.f32 0.01, %v151_v40  ;;  %v184_v50 = vmul.f32 0.01, %v152_v41 }
   0xe   :  { %v138_v53 = vadd.f32 %v122_v46, %v72_v44  ;;  %v139_v54 = vadd.f32 %v123_v47, %v73_v45  ;;  %vm169_vm2 = vcmp.ge.f32.partialorder %v153_v51, 0.0  ;;  %vm170_vm3 = vcmp.ge.f32.partialorder %v154_v52, 0.0 }
   0xf   :  { %v199_v55 = vsel %vm167_vm0, %v151_v40, %v183_v49  ;;  %v200_v56 = vsel %vm168_vm1, %v152_v41, %v184_v50  ;;  %v185_v61 = vmul.f32 0.01, %v153_v51  ;;  %v186_v62 = vmul.f32 0.01, %v154_v52  ;;  %v360_v50 = vld [vmem:[%s551_s0 + $0x30] sm:$0xff]  }
  0x10   :  { %v318_v60 = vpack.c.bf16 %v200_v56, %v199_v55  ;;  %v155_v63 = vadd.f32 %v425_v13, %v138_v53  ;;  %v156_v0 = vadd.f32 %v425_v13, %v139_v54  ;;  %v57_v1 = vmul.f32 %v265_v57, %v410_v5 }
  0x11   :  { %v201_v2 = vsel %vm169_vm2, %v153_v51, %v185_v61  ;;  %v58_v3 = vmul.f32 %v266_v58, %v410_v5  ;;  %v297_v4 = vunpack.c.l.bf16 %v364_v59  ;;  %v298_v7 = vunpack.c.h.bf16 %v364_v59  ;;  %v367_v51 = vld [vmem:[%s553_s2 + $0x30] sm:$0xff]  }
  0x12   :  { %319 = vst [vmem:[%s555_s4] sm:$0xff] %v318_v60   ;;  %v202_v9 = vsel %vm170_vm3, %v154_v52, %v186_v62  ;;  %vm171_vm4 = vcmp.ge.f32.partialorder %v155_v63, 0.0  ;;  %vm172_vm5 = vcmp.ge.f32.partialorder %v156_v0, 0.0  ;;  %v187_v10 = vmul.f32 0.01, %v155_v63 }
  0x13   :  { %v323_v14 = vpack.c.bf16 %v202_v9, %v201_v2  ;;  %v188_v15 = vmul.f32 0.01, %v156_v0  ;;  %v74_v16 = vadd.f32 %v412_v6, %v57_v1  ;;  %v75_v17 = vadd.f32 %v412_v6, %v58_v3 }
  0x14   :  { %v203_v18 = vsel %vm171_vm4, %v155_v63, %v187_v10  ;;  %v124_v19 = vmul.f32 %v297_v4, %v423_v12  ;;  %v125_v20 = vmul.f32 %v298_v7, %v423_v12  ;;  %v269_v21 = vunpack.c.l.bf16 %v358_v8 }
  0x15   :  { %369 = vst [vmem:[%s555_s4 + $0x8] sm:$0xff] %v323_v14   ;;  %v204_v23 = vsel %vm172_vm5, %v156_v0, %v188_v15  ;;  %v270_v24 = vunpack.c.h.bf16 %v358_v8  ;;  %v301_v25 = vunpack.c.l.bf16 %v365_v11  ;;  %v302_v26 = vunpack.c.h.bf16 %v365_v11  ;;  %v361_v14 = vld [vmem:[%s551_s0 + $0x38] sm:$0xff]  }
  0x16   :  { %v328_v27 = vpack.c.bf16 %v204_v23, %v203_v18  ;;  %v140_v28 = vadd.f32 %v124_v19, %v74_v16  ;;  %v141_v29 = vadd.f32 %v125_v20, %v75_v17  ;;  %v59_v30 = vmul.f32 %v269_v21, %v410_v5  ;;  %v368_v18 = vld [vmem:[%s553_s2 + $0x38] sm:$0xff]  }
  0x17   :  { %v60_v32 = vmul.f32 %v270_v24, %v410_v5  ;;  %v126_v33 = vmul.f32 %v301_v25, %v423_v12  ;;  %v127_v34 = vmul.f32 %v302_v26, %v423_v12  ;;  %v273_v35 = vunpack.c.l.bf16 %v359_v22 }
  0x18   :  { %370 = vst [vmem:[%s555_s4 + $0x10] sm:$0xff] %v328_v27   ;;  %v157_v36 = vadd.f32 %v425_v13, %v140_v28  ;;  %v158_v37 = vadd.f32 %v425_v13, %v141_v29  ;;  %v76_v38 = vadd.f32 %v412_v6, %v59_v30  ;;  %v274_v39 = vunpack.c.h.bf16 %v359_v22 }
  0x19   :  { %v77_v40 = vadd.f32 %v412_v6, %v60_v32  ;;  %v61_v41 = vmul.f32 %v273_v35, %v410_v5  ;;  %v305_v42 = vunpack.c.l.bf16 %v366_v31  ;;  %v306_v43 = vunpack.c.h.bf16 %v366_v31 }
  0x1a   :  { %vm173_vm6 = vcmp.ge.f32.partialorder %v157_v36, 0.0  ;;  %vm174_vm7 = vcmp.ge.f32.partialorder %v158_v37, 0.0  ;;  %v189_v44 = vmul.f32 0.01, %v157_v36  ;;  %v190_v45 = vmul.f32 0.01, %v158_v37 }
  0x1b   :  { %v142_v46 = vadd.f32 %v126_v33, %v76_v38  ;;  %v143_v47 = vadd.f32 %v127_v34, %v77_v40  ;;  %v62_v48 = vmul.f32 %v274_v39, %v410_v5  ;;  %v78_v49 = vadd.f32 %v412_v6, %v61_v41 }
  0x1c   :  { %v205_v52 = vsel %vm173_vm6, %v157_v36, %v189_v44  ;;  %v206_v53 = vsel %vm174_vm7, %v158_v37, %v190_v45  ;;  %v128_v54 = vmul.f32 %v305_v42, %v423_v12  ;;  %v129_v55 = vmul.f32 %v306_v43, %v423_v12 }
  0x1d   :  { %v333_v56 = vpack.c.bf16 %v206_v53, %v205_v52  ;;  %v159_v57 = vadd.f32 %v425_v13, %v142_v46  ;;  %v160_v58 = vadd.f32 %v425_v13, %v143_v47  ;;  %v79_v59 = vadd.f32 %v412_v6, %v62_v48 }
  0x1e   :  { %v144_v60 = vadd.f32 %v128_v54, %v78_v49  ;;  %v277_v61 = vunpack.c.l.bf16 %v360_v50  ;;  %v278_v62 = vunpack.c.h.bf16 %v360_v50  ;;  %v309_v63 = vunpack.c.l.bf16 %v367_v51 }
  0x1f   :  { %371 = vst [vmem:[%s555_s4 + $0x18] sm:$0xff] %v333_v56   ;;  %vm175_vm8 = vcmp.ge.f32.partialorder %v159_v57, 0.0  ;;  %vm176_vm9 = vcmp.ge.f32.partialorder %v160_v58, 0.0  ;;  %v191_v0 = vmul.f32 0.01, %v159_v57  ;;  %v145_v1 = vadd.f32 %v129_v55, %v79_v59 }
  0x20   :  { %v192_v2 = vmul.f32 0.01, %v160_v58  ;;  %v161_v3 = vadd.f32 %v425_v13, %v144_v60  ;;  %v63_v4 = vmul.f32 %v277_v61, %v410_v5  ;;  %v64_v7 = vmul.f32 %v278_v62, %v410_v5 }
  0x21   :  { %v207_v8 = vsel %vm175_vm8, %v159_v57, %v191_v0  ;;  %v162_v9 = vadd.f32 %v425_v13, %v145_v1  ;;  %v310_v10 = vunpack.c.h.bf16 %v367_v51  ;;  %v130_v11 = vmul.f32 %v309_v63, %v423_v12 }
  0x22   :  { %v208_v15 = vsel %vm176_vm9, %v160_v58, %v192_v2  ;;  %vm177_vm10 = vcmp.ge.f32.partialorder %v161_v3, 0.0  ;;  %v193_v16 = vmul.f32 0.01, %v161_v3  ;;  %v80_v17 = vadd.f32 %v412_v6, %v63_v4 }
  0x23   :  { %v338_v19 = vpack.c.bf16 %v208_v15, %v207_v8  ;;  %vm178_vm11 = vcmp.ge.f32.partialorder %v162_v9, 0.0  ;;  %v194_v20 = vmul.f32 0.01, %v162_v9  ;;  %v81_v21 = vadd.f32 %v412_v6, %v64_v7 }
  0x24   :  { %v209_v22 = vsel %vm177_vm10, %v161_v3, %v193_v16  ;;  %v131_v23 = vmul.f32 %v310_v10, %v423_v12  ;;  %v146_v24 = vadd.f32 %v130_v11, %v80_v17  ;;  %v281_v25 = vunpack.c.l.bf16 %v361_v14 }
  0x25   :  { %372 = vst [vmem:[%s555_s4 + $0x20] sm:$0xff] %v338_v19   ;;  %v210_v26 = vsel %vm178_vm11, %v162_v9, %v194_v20  ;;  %v282_v27 = vunpack.c.h.bf16 %v361_v14  ;;  %v313_v28 = vunpack.c.l.bf16 %v368_v18  ;;  %v314_v29 = vunpack.c.h.bf16 %v368_v18 }
  0x26   :  { %v343_v30 = vpack.c.bf16 %v210_v26, %v209_v22  ;;  %v147_v31 = vadd.f32 %v131_v23, %v81_v21  ;;  %v163_v32 = vadd.f32 %v425_v13, %v146_v24  ;;  %v65_v33 = vmul.f32 %v281_v25, %v410_v5 }
  0x27   :  { %v66_v34 = vmul.f32 %v282_v27, %v410_v5  ;;  %v132_v35 = vmul.f32 %v313_v28, %v423_v12  ;;  %v133_v36 = vmul.f32 %v314_v29, %v423_v12 }
  0x28   :  { %373 = vst [vmem:[%s555_s4 + $0x28] sm:$0xff] %v343_v30   ;;  %v164_v37 = vadd.f32 %v425_v13, %v147_v31  ;;  %vm179_vm12 = vcmp.ge.f32.partialorder %v163_v32, 0.0  ;;  %v195_v38 = vmul.f32 0.01, %v163_v32  ;;  %v82_v39 = vadd.f32 %v412_v6, %v65_v33 }
  0x29   :  { %v83_v40 = vadd.f32 %v412_v6, %v66_v34 }
  0x2a   :  { %vm180_vm13 = vcmp.ge.f32.partialorder %v164_v37, 0.0  ;;  %v196_v41 = vmul.f32 0.01, %v164_v37  ;;  %v211_v42 = vsel %vm179_vm12, %v163_v32, %v195_v38  ;;  %v148_v5 = vadd.f32 %v132_v35, %v82_v39 }
  0x2b   :  { %v149_v43 = vadd.f32 %v133_v36, %v83_v40 }
  0x2c   :  { %v212_v44 = vsel %vm180_vm13, %v164_v37, %v196_v41  ;;  %v165_v12 = vadd.f32 %v425_v13, %v148_v5 }
  0x2d   :  { %v348_v45 = vpack.c.bf16 %v212_v44, %v211_v42  ;;  %v166_v46 = vadd.f32 %v425_v13, %v149_v43 }
  0x2e   :  { %vm181_vm14 = vcmp.ge.f32.partialorder %v165_v12, 0.0  ;;  %v197_v47 = vmul.f32 0.01, %v165_v12 }
  0x2f   :  { %374 = vst [vmem:[%s555_s4 + $0x30] sm:$0xff] %v348_v45   ;;  %vm182_vm15 = vcmp.ge.f32.partialorder %v166_v46, 0.0  ;;  %v198_v48 = vmul.f32 0.01, %v166_v46 }
  0x30   :  { %v213_v6 = vsel %vm181_vm14, %v165_v12, %v197_v47 }
  0x31   :  { %v214_v49 = vsel %vm182_vm15, %v166_v46, %v198_v48 }
  0x32   :  { %v353_v50 = vpack.c.bf16 %v214_v49, %v213_v6 }
  0x34   :  { %375 = vst [vmem:[%s555_s4 + $0x38] sm:$0xff] %v353_v50  }

</bundles_post_ra>
